<compile_context>
chip_gen: v6e
topology: v6e:2x2x1
jax: 0.10.0
libtpu: 0.0.40
codegen_flags: <defaults>
</compile_context>

<pallas_src>
import functools
import math

import numpy as np
import jax
import jax.numpy as jnp
from jax.experimental import pallas as pl
from jax.experimental.pallas import tpu as pltpu

EPS = 1e-5
LANE = 128
_VMEM_LIMIT = 48 * 1024 * 1024      # <= v7x physical 64 MiB, fine on v5e/v6e


def _round_up(x, m):
    return (x + m - 1) // m * m


# ----------------------------- Pallas kernels -----------------------------

def conv_halo_kernel(band_ref, top_ref, bot_ref, w_ref, scale_ref, bias_ref,
                     y_ref, stats_ref, *, band_h, width, fuse_input_affine):
    """3x3 SAME conv on one H-band; halo / dx handling done in VMEM.

    band_ref  : (band_h, W, C)  bf16   raw activation rows of this band
    top_ref   : (1, W, C)       bf16   row above the band (index clamped)
    bot_ref   : (1, W, C)       bf16   row below the band (index clamped)
    w_ref     : (3, 3*C, Cp)    bf16   one (3C, Cp) matrix per dy
    scale_ref : (1, C)          f32    folded BN affine of the previous stage
    bias_ref  : (1, C)          f32
    y_ref     : (band_h, W, Cp) bf16   conv output
    stats_ref : (1, 2, Cp)      f32    row0 = sum, row1 = sum of squares
    """
    j = pl.program_id(1)
    nbh = pl.num_programs(1)
    W = width
    R = band_h + 2
    C = band_ref.shape[-1]
    rtot = R * W
    rows = band_h * W

    x = jnp.concatenate([top_ref[...], band_ref[...], bot_ref[...]], axis=0)
    xf = x.astype(jnp.float32).reshape(rtot, C)

    if fuse_input_affine:
        # fused BN affine + ReLU of the previous stage (per-channel)
        xf = jnp.maximum(xf * scale_ref[...] + bias_ref[...], 0.0)

    # SAME zero padding: the halo rows at the image top/bottom must be zero
    # *after* the fused activation.
    rowi = jax.lax.broadcasted_iota(jnp.int32, (rtot, C), 0)
    xf = jnp.where(jnp.logical_and(rowi < W, j == 0), 0.0, xf)
    xf = jnp.where(jnp.logical_and(rowi >= rtot - W, j == nbh - 1), 0.0, xf)

    # dx unroll in VMEM: x[.., w-1] / x[.., w] / x[.., w+1] via sublane rolls
    # of the row-flattened band + edge-column masks, concatenated along lanes
    # (C % 128 == 0 so the concat is lane-aligned).  K becomes 3*C.
    col = rowi % W
    x_l = jnp.where(col == 0, 0.0, pltpu.roll(xf, 1, 0))
    x_r = jnp.where(col == W - 1, 0.0, pltpu.roll(xf, rtot - 1, 0))
    lhs = jnp.concatenate([x_l, xf, x_r], axis=-1).astype(jnp.bfloat16)

    acc = jnp.dot(lhs[0:rows], w_ref[0], preferred_element_type=jnp.float32)
    acc = acc + jnp.dot(lhs[W:W + rows], w_ref[1],
                        preferred_element_type=jnp.float32)
    acc = acc + jnp.dot(lhs[2 * W:2 * W + rows], w_ref[2],
                        preferred_element_type=jnp.float32)

    # BN partials from the f32 accumulator (VPU/XLU reduce; keeps MXU free)
    cp = acc.shape[-1]
    stats_ref[0:1, 0:1, :] = jnp.sum(acc, axis=0,
                                     keepdims=True).reshape(1, 1, cp)
    stats_ref[0:1, 1:2, :] = jnp.sum(acc * acc, axis=0,
                                     keepdims=True).reshape(1, 1, cp)

    # bf16 output (stats already taken from f32)
    y_ref[...] = acc.reshape(band_h, W, cp).astype(y_ref.dtype)


def conv_unrolled_kernel(x_ref, w_ref, y_ref, stats_ref, *, band_h, width):
    """Merged-K conv for small Cin: one matmul over a 9-tap unrolled band.

    x_ref : (band_h, W, 9*Cin) bf16, w_ref : (9*Cin, Cp) bf16.
    """
    rows = band_h * width
    k9 = x_ref.shape[-1]
    lhs = x_ref[...].reshape(rows, k9)
    acc = jnp.dot(lhs, w_ref[...], preferred_element_type=jnp.float32)
    cp = acc.shape[-1]
    stats_ref[0:1, 0:1, :] = jnp.sum(acc, axis=0,
                                     keepdims=True).reshape(1, 1, cp)
    stats_ref[0:1, 1:2, :] = jnp.sum(acc * acc, axis=0,
                                     keepdims=True).reshape(1, 1, cp)
    y_ref[...] = acc.reshape(band_h, width, cp).astype(y_ref.dtype)


def bn_relu_pool_kernel(y_ref, scale_ref, bias_ref, o_ref, *, cp):
    """Folded-BN affine + ReLU + 2x2 average pool on one band.

    y_ref : (band_h, W//2, 2*Cp) bf16  -- W-neighbour pairs live along lanes
    o_ref : (band_h//2, W//2, Cp) f32
    """
    z = y_ref[...].astype(jnp.float32) * scale_ref[...] + bias_ref[...]
    z = jnp.maximum(z, 0.0)
    zw = z[:, :, :cp] + z[:, :, cp:]                # pool along W (lane-slice)
    bh, w2 = zw.shape[0], zw.shape[1]
    zz = zw.reshape(bh // 2, 2, w2, cp)             # leading-dim split only
    o_ref[...] = (0.25 * jnp.sum(zz, axis=1)).astype(o_ref.dtype)


# --------------------------- pallas_call wrappers ---------------------------

def _conv_halo_stage(act, wmat, scale_in, bias_in, *, band_h,
                     fuse_input_affine, cp):
    """act: (N, H, W, C) bf16 with C % 128 == 0.  Returns (y bf16, stats)."""
    N, H, W, C = act.shape
    assert C % LANE == 0
    nbh = H // band_h
    rows = band_h * W
    kernel = functools.partial(conv_halo_kernel, band_h=band_h, width=W,
                               fuse_input_affine=fuse_input_affine)

    band_map = lambda n, j: (n, j, 0, 0)
    top_map = lambda n, j: (n, jnp.maximum(j * band_h - 1, 0), 0, 0)
    bot_map = lambda n, j: (n, jnp.minimum((j + 1) * band_h, H - 1), 0, 0)
    const3 = lambda n, j: (0, 0, 0)
    const2 = lambda n, j: (0, 0)

    flops = 2 * N * nbh * rows * 3 * C * cp + 4 * N * H * W * cp
    bytes_accessed = int(act.size * 2 * (1 + 2.0 / band_h) + wmat.size * 2
                         + N * H * W * cp * 2 + N * nbh * 2 * cp * 4)

    y, stats = pl.pallas_call(
        kernel,
        out_shape=(jax.ShapeDtypeStruct((N, H, W, cp), jnp.bfloat16),
                   jax.ShapeDtypeStruct((N, nbh, 2, cp), jnp.float32)),
        grid=(N, nbh),
        in_specs=[
            pl.BlockSpec((None, band_h, W, C), band_map),
            pl.BlockSpec((None, 1, W, C), top_map),
            pl.BlockSpec((None, 1, W, C), bot_map),
            pl.BlockSpec((3, 3 * C, cp), const3),
            pl.BlockSpec((1, C), const2),
            pl.BlockSpec((1, C), const2),
        ],
        out_specs=(
            pl.BlockSpec((None, band_h, W, cp), band_map),
            pl.BlockSpec((None, 1, 2, cp), lambda n, j: (n, j, 0, 0)),
        ),
        compiler_params=pltpu.CompilerParams(
            dimension_semantics=("parallel", "parallel"),
            vmem_limit_bytes=_VMEM_LIMIT),
        cost_estimate=pl.CostEstimate(flops=flops, transcendentals=0,
                                      bytes_accessed=bytes_accessed),
    )(act, act, act, wmat, scale_in, bias_in)
    return y, stats


def _conv_unrolled_stage(x9, w9, *, band_h, cp):
    N, H, W, K9 = x9.shape
    nbh = H // band_h
    kernel = functools.partial(conv_unrolled_kernel, band_h=band_h, width=W)
    band_map = lambda n, j: (n, j, 0, 0)
    flops = 2 * N * H * W * K9 * cp + 4 * N * H * W * cp
    bytes_accessed = int(x9.size * 2 + w9.size * 2 + N * H * W * cp * 2)
    y, stats = pl.pallas_call(
        kernel,
        out_shape=(jax.ShapeDtypeStruct((N, H, W, cp), jnp.bfloat16),
                   jax.ShapeDtypeStruct((N, nbh, 2, cp), jnp.float32)),
        grid=(N, nbh),
        in_specs=[
            pl.BlockSpec((None, band_h, W, K9), band_map),
            pl.BlockSpec((K9, cp), lambda n, j: (0, 0)),
        ],
        out_specs=(
            pl.BlockSpec((None, band_h, W, cp), band_map),
            pl.BlockSpec((None, 1, 2, cp), lambda n, j: (n, j, 0, 0)),
        ),
        compiler_params=pltpu.CompilerParams(
            dimension_semantics=("parallel", "parallel"),
            vmem_limit_bytes=_VMEM_LIMIT),
        cost_estimate=pl.CostEstimate(flops=flops, transcendentals=0,
                                      bytes_accessed=bytes_accessed),
    )(x9, w9)
    return y, stats


def _bn_relu_pool(y2_pairs, scale2x, bias2x, *, band_h, cp):
    N, H, W2, C2 = y2_pairs.shape
    nbh = H // band_h
    return pl.pallas_call(
        functools.partial(bn_relu_pool_kernel, cp=cp),
        out_shape=jax.ShapeDtypeStruct((N, H // 2, W2, cp), jnp.float32),
        grid=(N, nbh),
        in_specs=[
            pl.BlockSpec((None, band_h, W2, C2), lambda n, j: (n, j, 0, 0)),
            pl.BlockSpec((1, 1, C2), lambda n, j: (0, 0, 0)),
            pl.BlockSpec((1, 1, C2), lambda n, j: (0, 0, 0)),
        ],
        out_specs=pl.BlockSpec((None, band_h // 2, W2, cp),
                               lambda n, j: (n, j, 0, 0)),
        compiler_params=pltpu.CompilerParams(
            dimension_semantics=("parallel", "parallel"),
            vmem_limit_bytes=_VMEM_LIMIT),
    )(y2_pairs, scale2x, bias2x)


# ------------------------------- JAX glue ----------------------------------

def _unroll9(x_nhwc):
    """(N,H,W,C) -> (N,H,W,9C) bf16: all nine zero-padded 3x3 taps unrolled
    along channels, tap order (dy*3 + dx).  Only used when Cin is tiny."""
    N, H, W, C = x_nhwc.shape
    xp = jnp.pad(x_nhwc, ((0, 0), (1, 1), (1, 1), (0, 0)))
    taps = [xp[:, dy:dy + H, dx:dx + W, :]
            for dy in range(3) for dx in range(3)]
    return jnp.concatenate(taps, axis=-1).astype(jnp.bfloat16)


def _weight_rows(w_oihw, cin_pad, cout_pad):
    """(Cout,Cin,3,3) -> (3, 3*cin_pad, cout_pad) bf16, row = dx*cin_pad+cin."""
    cout, cin = w_oihw.shape[0], w_oihw.shape[1]
    w = jnp.pad(w_oihw, ((0, cout_pad - cout), (0, cin_pad - cin),
                         (0, 0), (0, 0)))
    w = jnp.transpose(w, (2, 3, 1, 0))            # (dy, dx, cin_pad, cout_pad)
    return w.reshape(3, 3 * cin_pad, cout_pad).astype(jnp.bfloat16)


def _weight_k9(w_oihw, cout_pad):
    """(Cout,Cin,3,3) -> (9*Cin, cout_pad) bf16, row = (dy*3+dx)*Cin + cin."""
    cout = w_oihw.shape[0]
    w = jnp.transpose(w_oihw, (2, 3, 1, 0))       # (dy, dx, cin, cout)
    w = w.reshape(-1, cout)
    return jnp.pad(w, ((0, 0), (0, cout_pad - cout))).astype(jnp.bfloat16)


def _bn_affine(stats, gamma, beta, count, cp):
    """Fold batch stats + gamma/beta into a per-channel scale/bias (padded)."""
    cout = gamma.size
    total = jnp.sum(stats.astype(jnp.float32), axis=(0, 1))      # (2, cp)
    mean = total[0] / count
    var = jnp.maximum(total[1] / count - mean * mean, 0.0)
    g = jnp.pad(gamma.reshape(-1).astype(jnp.float32), (0, cp - cout),
                constant_values=1.0)
    b = jnp.pad(beta.reshape(-1).astype(jnp.float32), (0, cp - cout))
    scale = g * jax.lax.rsqrt(var + EPS)
    bias = b - mean * scale
    return scale.reshape(1, cp), bias.reshape(1, cp)


def _pick_band_h(N, H, W, cp, budget_bytes=24 << 20, min_steps=4):
    """Largest even band that fits the VMEM budget, keeping >= min_steps grid
    steps so the single parallel grid load-balances across v7x's two cores."""
    divisors = [bh for bh in range(2, H + 1, 2) if H % bh == 0]
    fits = [bh for bh in divisors if (bh + 2) * W * cp * 24 <= budget_bytes]
    if not fits:
        return 2
    balanced = [bh for bh in fits if N * (H // bh) >= min_steps]
    return max(balanced) if balanced else max(fits)


def conv_block_forward(x_nchw, w1_oihw, w2_oihw,
                       gamma1, beta1, gamma2, beta2,
                       pool_size=(2, 2), pool_type='avg', band_h=None):
    """Pallas implementation of ConvBlock.forward (training-mode BatchNorm)."""
    assert pool_type == 'avg' and tuple(pool_size) == (2, 2)
    N, Cin, H, W = x_nchw.shape
    Cout = w1_oihw.shape[0]
    assert H % 2 == 0 and W % 2 == 0, "2x2 avg pooling needs even H, W"
    assert W % 16 == 0, "W must be a multiple of 16 (bf16 sublane packing)"

    cp = _round_up(Cout, LANE)          # lane-dense output channels
    if band_h is None:
        band_h = _pick_band_h(N, H, W, cp)
    assert band_h % 2 == 0 and H % band_h == 0
    count = N * H * W

    x_nhwc = jnp.transpose(x_nchw, (0, 2, 3, 1)).astype(jnp.bfloat16)

    # ---- stage 1: conv1 (+ BN1 batch-stat partials) ----
    if 9 * Cin <= 256:
        # small Cin: one merged K=9*Cin matmul per band over a tiny 9-tap
        # unroll (3x fewer MXU LHS pushes than the per-dy formulation).
        x9 = _unroll9(x_nhwc)
        w1m = _weight_k9(w1_oihw, cp)
        y1, st1 = _conv_unrolled_stage(x9, w1m, band_h=band_h, cp=cp)
    else:
        cinp = _round_up(Cin, LANE)
        xpad = jnp.pad(x_nhwc, ((0, 0), (0, 0), (0, 0), (0, cinp - Cin)))
        w1m = _weight_rows(w1_oihw, cinp, cp)
        one = jnp.ones((1, cinp), jnp.float32)
        zero = jnp.zeros((1, cinp), jnp.float32)
        y1, st1 = _conv_halo_stage(xpad, w1m, one, zero, band_h=band_h,
                                   fuse_input_affine=False, cp=cp)
    scale1, bias1 = _bn_affine(st1, gamma1, beta1, count, cp)

    # ---- stage 2: conv2 with fused BN1-affine + ReLU applied to its input ----
    w2m = _weight_rows(w2_oihw, cp, cp)
    y2, st2 = _conv_halo_stage(y1, w2m, scale1, bias1,
                               band_h=band_h, fuse_input_affine=True, cp=cp)
    scale2, bias2 = _bn_affine(st2, gamma2, beta2, count, cp)

    # ---- BN2 + ReLU + 2x2 avg pool ----
    # (N,H,W,cp) -> (N,H,W//2,2cp): free view putting the two W-neighbours of
    # each pooling window along lanes.
    y2p = y2.reshape(N, H, W // 2, 2 * cp)
    scale2x = jnp.concatenate([scale2, scale2], axis=-1).reshape(1, 1, 2 * cp)
    bias2x = jnp.concatenate([bias2, bias2], axis=-1).reshape(1, 1, 2 * cp)
    pooled = _bn_relu_pool(y2p, scale2x, bias2x, band_h=band_h, cp=cp)

    out = pooled[..., :Cout]
    return jnp.transpose(out, (0, 3, 1, 2))                    # back to NCHW


# --------------------------- pure-JAX reference -----------------------------

def reference_forward(x_nchw, w1_oihw, w2_oihw):
    x = jnp.transpose(x_nchw, (0, 2, 3, 1))

    def conv(x, w):
        wk = jnp.transpose(w, (2, 3, 1, 0))            # OIHW -> HWIO
        return jax.lax.conv_general_dilated(
            x, wk, (1, 1), 'SAME',
            dimension_numbers=('NHWC', 'HWIO', 'NHWC'),
            precision=jax.lax.Precision.HIGHEST)

    def bn_relu(y):
        mean = y.mean(axis=(0, 1, 2), keepdims=True)
        var = ((y - mean) ** 2).mean(axis=(0, 1, 2), keepdims=True)
        return jnp.maximum((y - mean) * jax.lax.rsqrt(var + EPS), 0.0)

    y = bn_relu(conv(x, w1_oihw))
    y = bn_relu(conv(y, w2_oihw))
    Nn, Hh, Ww, C = y.shape
    y = y.reshape(Nn, Hh // 2, 2, Ww // 2, 2, C).mean(axis=(2, 4))
    return jnp.transpose(y, (0, 3, 1, 2))


def xavier_uniform(key, shape_oihw):
    cout, cin, kh, kw = shape_oihw
    fan_in = cin * kh * kw
    fan_out = cout * kh * kw
    bound = math.sqrt(6.0 / (fan_in + fan_out))
    return jax.random.uniform(key, shape_oihw, jnp.float32, -bound, bound)


# ---------------------------------- main ------------------------------------

if __name__ == "__main__":
    N, Cin, Cout, H, W = 2, 4, 8, 16, 16

    key = jax.random.PRNGKey(0)
    kx, k1, k2 = jax.random.split(key, 3)

    x = jax.random.normal(kx, (N, Cin, H, W), jnp.float32)     # NCHW input
    w1 = xavier_uniform(k1, (Cout, Cin, 3, 3))
    w2 = xavier_uniform(k2, (Cout, Cout, 3, 3))
    gamma1 = jnp.ones((1, Cout), jnp.float32)
    beta1 = jnp.zeros((1, Cout), jnp.float32)
    gamma2 = jnp.ones((1, Cout), jnp.float32)
    beta2 = jnp.zeros((1, Cout), jnp.float32)

    fwd = jax.jit(conv_block_forward,
                  static_argnames=("pool_size", "pool_type", "band_h"))
    # band_h=8 -> 2 bands per image (4 grid steps): exercises the halo path.
    out = fwd(x, w1, w2, gamma1, beta1, gamma2, beta2, band_h=8)
    out = jax.block_until_ready(out)

    ref = jax.block_until_ready(reference_forward(x, w1, w2))
    np.testing.assert_allclose(np.asarray(out), np.asarray(ref),
                               rtol=3e-2, atol=3e-2)
    assert out.shape == (N, Cout, H // 2, W // 2)

    print("KERNEL_OK")
</pallas_src>

<mosaic_0001>
module attributes {stable_mosaic.version = 11 : i64} {
  func.func @conv_unrolled_kernel(%arg0: i32, %arg1: i32, %arg2: memref<1x8x16x36xbf16, #tpu.memory_space<vmem>>, %arg3: memref<36x128xbf16, #tpu.memory_space<vmem>>, %arg4: memref<1x8x16x128xbf16, #tpu.memory_space<vmem>>, %arg5: memref<1x1x2x128xf32, #tpu.memory_space<vmem>>) attributes {dimension_semantics = [#tpu.dimension_semantics<parallel>, #tpu.dimension_semantics<parallel>], iteration_bounds = array<i64: 2, 2>, scalar_prefetch = 0 : i64, scratch_operands = 0 : i64, tpu.core_type = #tpu.core_type<tc>, window_params = [{transform_indices = @transform_0, window_bounds = array<i64: 1, 8, 16, 36>}, {pipeline_mode = #tpu.pipeline_mode<synchronous>, transform_indices = @transform_1, window_bounds = array<i64: 36, 128>}, {transform_indices = @transform_2, window_bounds = array<i64: 1, 8, 16, 128>}, {transform_indices = @transform_3, window_bounds = array<i64: 1, 1, 2, 128>}]} {
    %c0 = arith.constant 0 : index
    %c0_0 = arith.constant 0 : index
    %c0_1 = arith.constant 0 : index
    %c0_2 = arith.constant 0 : index
    %0 = vector.load %arg2[%c0, %c0_0, %c0_1, %c0_2] : memref<1x8x16x36xbf16, #tpu.memory_space<vmem>>, vector<1x8x16x36xbf16>
    %1 = vector.shape_cast %0 : vector<1x8x16x36xbf16> to vector<8x16x36xbf16>
    %2 = vector.shape_cast %1 : vector<8x16x36xbf16> to vector<128x36xbf16>
    %c0_3 = arith.constant 0 : index
    %c0_4 = arith.constant 0 : index
    %3 = vector.load %arg3[%c0_3, %c0_4] : memref<36x128xbf16, #tpu.memory_space<vmem>>, vector<36x128xbf16>
    %cst = arith.constant dense<0.000000e+00> : vector<128x128xf32>
    %4 = tpu.matmul %2, %3, %cst {dimension_numbers = #tpu.dot_dimension_numbers<[1], [0], [0], [1], [0, 0, 1, 1], [], []>} : vector<128x36xbf16>, vector<36x128xbf16>, vector<128x128xf32> -> vector<128x128xf32>
    %cst_5 = arith.constant dense<0.000000e+00> : vector<128xf32>
    %5 = vector.multi_reduction <add>, %4, %cst_5 [0] : vector<128x128xf32> to vector<128xf32>
    %6 = vector.shape_cast %5 : vector<128xf32> to vector<1x128xf32>
    %7 = vector.shape_cast %6 : vector<1x128xf32> to vector<1x1x128xf32>
    %c0_6 = arith.constant 0 : index
    %c0_7 = arith.constant 0 : index
    %c0_8 = arith.constant 0 : index
    %c0_9 = arith.constant 0 : index
    %8 = vector.load %arg5[%c0_6, %c0_7, %c0_8, %c0_9] : memref<1x1x2x128xf32, #tpu.memory_space<vmem>>, vector<1x1x1x128xf32>
    %9 = vector.shape_cast %8 : vector<1x1x1x128xf32> to vector<1x1x128xf32>
    %10 = vector.shape_cast %7 : vector<1x1x128xf32> to vector<1x1x1x128xf32>
    tpu.vector_store %arg5[%c0_6, %c0_7, %c0_8, %c0_9], %10 {strides = array<i32>} : memref<1x1x2x128xf32, #tpu.memory_space<vmem>>, vector<1x1x1x128xf32>,
    %11 = arith.mulf %4, %4 : vector<128x128xf32>
    %cst_10 = arith.constant dense<0.000000e+00> : vector<128xf32>
    %12 = vector.multi_reduction <add>, %11, %cst_10 [0] : vector<128x128xf32> to vector<128xf32>
    %13 = vector.shape_cast %12 : vector<128xf32> to vector<1x128xf32>
    %14 = vector.shape_cast %13 : vector<1x128xf32> to vector<1x1x128xf32>
    %c0_11 = arith.constant 0 : index
    %c0_12 = arith.constant 0 : index
    %c1 = arith.constant 1 : index
    %c0_13 = arith.constant 0 : index
    %15 = vector.load %arg5[%c0_11, %c0_12, %c1, %c0_13] : memref<1x1x2x128xf32, #tpu.memory_space<vmem>>, vector<1x1x1x128xf32>
    %16 = vector.shape_cast %15 : vector<1x1x1x128xf32> to vector<1x1x128xf32>
    %17 = vector.shape_cast %14 : vector<1x1x128xf32> to vector<1x1x1x128xf32>
    tpu.vector_store %arg5[%c0_11, %c0_12, %c1, %c0_13], %17 {strides = array<i32>} : memref<1x1x2x128xf32, #tpu.memory_space<vmem>>, vector<1x1x1x128xf32>,
    %18 = vector.shape_cast %4 : vector<128x128xf32> to vector<8x16x128xf32>
    %19 = arith.truncf %18 : vector<8x16x128xf32> to vector<8x16x128xbf16>
    %c0_14 = arith.constant 0 : index
    %c0_15 = arith.constant 0 : index
    %c0_16 = arith.constant 0 : index
    %c0_17 = arith.constant 0 : index
    %20 = vector.load %arg4[%c0_14, %c0_15, %c0_16, %c0_17] : memref<1x8x16x128xbf16, #tpu.memory_space<vmem>>, vector<1x8x16x128xbf16>
    %21 = vector.shape_cast %20 : vector<1x8x16x128xbf16> to vector<8x16x128xbf16>
    %22 = vector.shape_cast %19 : vector<8x16x128xbf16> to vector<1x8x16x128xbf16>
    tpu.vector_store %arg4[%c0_14, %c0_15, %c0_16, %c0_17], %22 {strides = array<i32>} : memref<1x8x16x128xbf16, #tpu.memory_space<vmem>>, vector<1x8x16x128xbf16>,
    return
  }
  func.func @transform_0(%arg0: i32, %arg1: i32) -> (i32, i32, i32, i32) {
    %c0_i32 = arith.constant 0 : i32
    %c0_i32_0 = arith.constant 0 : i32
    %c0_i32_1 = arith.constant 0 : i32
    return %arg0, %arg1, %c0_i32, %c0_i32_0 : i32, i32, i32, i32
  }
  func.func @transform_1(%arg0: i32, %arg1: i32) -> (i32, i32) {
    %c0_i32 = arith.constant 0 : i32
    %c0_i32_0 = arith.constant 0 : i32
    %c0_i32_1 = arith.constant 0 : i32
    return %c0_i32, %c0_i32_0 : i32, i32
  }
  func.func @transform_2(%arg0: i32, %arg1: i32) -> (i32, i32, i32, i32) {
    %c0_i32 = arith.constant 0 : i32
    %c0_i32_0 = arith.constant 0 : i32
    %c0_i32_1 = arith.constant 0 : i32
    return %arg0, %arg1, %c0_i32, %c0_i32_0 : i32, i32, i32, i32
  }
  func.func @transform_3(%arg0: i32, %arg1: i32) -> (i32, i32, i32, i32) {
    %c0_i32 = arith.constant 0 : i32
    %c0_i32_0 = arith.constant 0 : i32
    %c0_i32_1 = arith.constant 0 : i32
    return %arg0, %arg1, %c0_i32, %c0_i32_0 : i32, i32, i32, i32
  }
}

module attributes {stable_mosaic.version = 11 : i64} {
  func.func @conv_halo_kernel(%arg0: i32, %arg1: i32, %arg2: memref<1x8x16x128xbf16, #tpu.memory_space<vmem>>, %arg3: memref<1x1x16x128xbf16, #tpu.memory_space<vmem>>, %arg4: memref<1x1x16x128xbf16, #tpu.memory_space<vmem>>, %arg5: memref<3x384x128xbf16, #tpu.memory_space<vmem>>, %arg6: memref<1x128xf32, #tpu.memory_space<vmem>>, %arg7: memref<1x128xf32, #tpu.memory_space<vmem>>, %arg8: memref<1x8x16x128xbf16, #tpu.memory_space<vmem>>, %arg9: memref<1x1x2x128xf32, #tpu.memory_space<vmem>>) attributes {dimension_semantics = [#tpu.dimension_semantics<parallel>, #tpu.dimension_semantics<parallel>], iteration_bounds = array<i64: 2, 2>, scalar_prefetch = 0 : i64, scratch_operands = 0 : i64, tpu.core_type = #tpu.core_type<tc>, window_params = [{transform_indices = @transform_0, window_bounds = array<i64: 1, 8, 16, 128>}, {transform_indices = @transform_1, window_bounds = array<i64: 1, 1, 16, 128>}, {transform_indices = @transform_2, window_bounds = array<i64: 1, 1, 16, 128>}, {pipeline_mode = #tpu.pipeline_mode<synchronous>, transform_indices = @transform_3, window_bounds = array<i64: 3, 384, 128>}, {pipeline_mode = #tpu.pipeline_mode<synchronous>, transform_indices = @transform_4, window_bounds = array<i64: 1, 128>}, {pipeline_mode = #tpu.pipeline_mode<synchronous>, transform_indices = @transform_5, window_bounds = array<i64: 1, 128>}, {transform_indices = @transform_6, window_bounds = array<i64: 1, 8, 16, 128>}, {transform_indices = @transform_7, window_bounds = array<i64: 1, 1, 2, 128>}]} {
    %c0 = arith.constant 0 : index
    %c0_0 = arith.constant 0 : index
    %c0_1 = arith.constant 0 : index
    %c0_2 = arith.constant 0 : index
    %0 = vector.load %arg3[%c0, %c0_0, %c0_1, %c0_2] : memref<1x1x16x128xbf16, #tpu.memory_space<vmem>>, vector<1x1x16x128xbf16>
    %1 = vector.shape_cast %0 : vector<1x1x16x128xbf16> to vector<1x16x128xbf16>
    %c0_3 = arith.constant 0 : index
    %c0_4 = arith.constant 0 : index
    %c0_5 = arith.constant 0 : index
    %c0_6 = arith.constant 0 : index
    %2 = vector.load %arg2[%c0_3, %c0_4, %c0_5, %c0_6] : memref<1x8x16x128xbf16, #tpu.memory_space<vmem>>, vector<1x8x16x128xbf16>
    %3 = vector.shape_cast %2 : vector<1x8x16x128xbf16> to vector<8x16x128xbf16>
    %c0_7 = arith.constant 0 : index
    %c0_8 = arith.constant 0 : index
    %c0_9 = arith.constant 0 : index
    %c0_10 = arith.constant 0 : index
    %4 = vector.load %arg4[%c0_7, %c0_8, %c0_9, %c0_10] : memref<1x1x16x128xbf16, #tpu.memory_space<vmem>>, vector<1x1x16x128xbf16>
    %5 = vector.shape_cast %4 : vector<1x1x16x128xbf16> to vector<1x16x128xbf16>
    %6 = tpu.concatenate %1, %3, %5 in 0 : vector<1x16x128xbf16>, vector<8x16x128xbf16>, vector<1x16x128xbf16> -> vector<10x16x128xbf16>
    %7 = arith.extf %6 : vector<10x16x128xbf16> to vector<10x16x128xf32>
    %8 = vector.shape_cast %7 : vector<10x16x128xf32> to vector<160x128xf32>
    %c0_11 = arith.constant 0 : index
    %c0_12 = arith.constant 0 : index
    %9 = vector.load %arg6[%c0_11, %c0_12] : memref<1x128xf32, #tpu.memory_space<vmem>>, vector<1x128xf32>
    %10 = vector.broadcast %9 : vector<1x128xf32> to vector<160x128xf32>
    %11 = arith.mulf %8, %10 : vector<160x128xf32>
    %c0_13 = arith.constant 0 : index
    %c0_14 = arith.constant 0 : index
    %12 = vector.load %arg7[%c0_13, %c0_14] : memref<1x128xf32, #tpu.memory_space<vmem>>, vector<1x128xf32>
    %13 = vector.broadcast %12 : vector<1x128xf32> to vector<160x128xf32>
    %14 = arith.addf %11, %13 : vector<160x128xf32>
    %cst = arith.constant 0.000000e+00 : f32
    %15 = vector.broadcast %cst : f32 to vector<160x128xf32>
    %16 = arith.maximumf %14, %15 : vector<160x128xf32>
    %17 = tpu.iota {dimensions = array<i32: 0>} : vector<160x128xi32>
    %c16_i32 = arith.constant 16 : i32
    %18 = vector.broadcast %c16_i32 : i32 to vector<160x128xi32>
    %19 = arith.cmpi slt, %17, %18 : vector<160x128xi32>
    %c0_i32 = arith.constant 0 : i32
    %20 = arith.cmpi eq, %arg1, %c0_i32 : i32
    %21 = vector.broadcast %20 : i1 to vector<160x128xi1>
    %22 = arith.andi %19, %21 : vector<160x128xi1>
    %cst_15 = arith.constant 0.000000e+00 : f32
    %23 = vector.broadcast %cst_15 : f32 to vector<160x128xf32>
    %24 = arith.select %22, %23, %16 : vector<160x128xi1>, vector<160x128xf32>
    %c144_i32 = arith.constant 144 : i32
    %25 = vector.broadcast %c144_i32 : i32 to vector<160x128xi32>
    %26 = arith.cmpi sge, %17, %25 : vector<160x128xi32>
    %c1_i32 = arith.constant 1 : i32
    %27 = arith.cmpi eq, %arg1, %c1_i32 : i32
    %28 = vector.broadcast %27 : i1 to vector<160x128xi1>
    %29 = arith.andi %26, %28 : vector<160x128xi1>
    %cst_16 = arith.constant 0.000000e+00 : f32
    %30 = vector.broadcast %cst_16 : f32 to vector<160x128xf32>
    %31 = arith.select %29, %30, %24 : vector<160x128xi1>, vector<160x128xf32>
    %c16_i32_17 = arith.constant 16 : i32
    %c0_i32_18 = arith.constant 0 : i32
    %32 = arith.cmpi eq, %c16_i32_17, %c0_i32_18 : i32
    %c1_i32_19 = arith.constant 1 : i32
    %33 = arith.select %32, %c1_i32_19, %c16_i32_17 : i32
    %34 = vector.broadcast %33 : i32 to vector<160x128xi32>
    %35 = arith.remsi %17, %34 : vector<160x128xi32>
    %c0_i32_20 = arith.constant 0 : i32
    %36 = vector.broadcast %c0_i32_20 : i32 to vector<160x128xi32>
    %37 = arith.cmpi ne, %35, %36 : vector<160x128xi32>
    %c0_i32_21 = arith.constant 0 : i32
    %38 = vector.broadcast %c0_i32_21 : i32 to vector<160x128xi32>
    %39 = arith.cmpi slt, %35, %38 : vector<160x128xi32>
    %c0_i32_22 = arith.constant 0 : i32
    %40 = arith.cmpi slt, %33, %c0_i32_22 : i32
    %41 = vector.broadcast %40 : i1 to vector<160x128xi1>
    %42 = vector.broadcast %41 : vector<160x128xi1> to vector<160x128xi1>
    %43 = arith.xori %39, %42 : vector<160x128xi1>
    %44 = arith.andi %43, %37 : vector<160x128xi1>
    %45 = vector.broadcast %33 : i32 to vector<160x128xi32>
    %46 = arith.addi %35, %45 : vector<160x128xi32>
    %47 = arith.select %44, %46, %35 : vector<160x128xi1>, vector<160x128xi32>
    %c0_i32_23 = arith.constant 0 : i32
    %48 = vector.broadcast %c0_i32_23 : i32 to vector<160x128xi32>
    %49 = arith.cmpi eq, %47, %48 : vector<160x128xi32>
    %c1_i32_24 = arith.constant 1 : i32
    %50 = tpu.dynamic_rotate %31 by %c1_i32_24 dim 0 : vector<160x128xf32>, i32 -> vector<160x128xf32>
    %cst_25 = arith.constant 0.000000e+00 : f32
    %51 = vector.broadcast %cst_25 : f32 to vector<160x128xf32>
    %52 = arith.select %49, %51, %50 : vector<160x128xi1>, vector<160x128xf32>
    %c15_i32 = arith.constant 15 : i32
    %53 = vector.broadcast %c15_i32 : i32 to vector<160x128xi32>
    %54 = arith.cmpi eq, %47, %53 : vector<160x128xi32>
    %c159_i32 = arith.constant 159 : i32
    %55 = tpu.dynamic_rotate %31 by %c159_i32 dim 0 : vector<160x128xf32>, i32 -> vector<160x128xf32>
    %cst_26 = arith.constant 0.000000e+00 : f32
    %56 = vector.broadcast %cst_26 : f32 to vector<160x128xf32>
    %57 = arith.select %54, %56, %55 : vector<160x128xi1>, vector<160x128xf32>
    %58 = tpu.concatenate %52, %31, %57 in 1 : vector<160x128xf32>, vector<160x128xf32>, vector<160x128xf32> -> vector<160x384xf32>
    %59 = arith.truncf %58 : vector<160x384xf32> to vector<160x384xbf16>
    %60 = vector.extract_strided_slice %59 {offsets = [0, 0], sizes = [128, 384], strides = [1, 1]} : vector<160x384xbf16> to vector<128x384xbf16>
    %c0_27 = arith.constant 0 : index
    %c0_28 = arith.constant 0 : index
    %c0_29 = arith.constant 0 : index
    %61 = vector.load %arg5[%c0_27, %c0_28, %c0_29] : memref<3x384x128xbf16, #tpu.memory_space<vmem>>, vector<1x384x128xbf16>
    %62 = vector.shape_cast %61 : vector<1x384x128xbf16> to vector<384x128xbf16>
    %cst_30 = arith.constant dense<0.000000e+00> : vector<128x128xf32>
    %63 = tpu.matmul %60, %62, %cst_30 {dimension_numbers = #tpu.dot_dimension_numbers<[1], [0], [0], [1], [0, 0, 1, 1], [], []>} : vector<128x384xbf16>, vector<384x128xbf16>, vector<128x128xf32> -> vector<128x128xf32>
    %64 = vector.extract_strided_slice %59 {offsets = [16, 0], sizes = [128, 384], strides = [1, 1]} : vector<160x384xbf16> to vector<128x384xbf16>
    %c1 = arith.constant 1 : index
    %c0_31 = arith.constant 0 : index
    %c0_32 = arith.constant 0 : index
    %65 = vector.load %arg5[%c1, %c0_31, %c0_32] : memref<3x384x128xbf16, #tpu.memory_space<vmem>>, vector<1x384x128xbf16>
    %66 = vector.shape_cast %65 : vector<1x384x128xbf16> to vector<384x128xbf16>
    %cst_33 = arith.constant dense<0.000000e+00> : vector<128x128xf32>
    %67 = tpu.matmul %64, %66, %cst_33 {dimension_numbers = #tpu.dot_dimension_numbers<[1], [0], [0], [1], [0, 0, 1, 1], [], []>} : vector<128x384xbf16>, vector<384x128xbf16>, vector<128x128xf32> -> vector<128x128xf32>
    %68 = arith.addf %63, %67 : vector<128x128xf32>
    %69 = vector.extract_strided_slice %59 {offsets = [32, 0], sizes = [128, 384], strides = [1, 1]} : vector<160x384xbf16> to vector<128x384xbf16>
    %c2 = arith.constant 2 : index
    %c0_34 = arith.constant 0 : index
    %c0_35 = arith.constant 0 : index
    %70 = vector.load %arg5[%c2, %c0_34, %c0_35] : memref<3x384x128xbf16, #tpu.memory_space<vmem>>, vector<1x384x128xbf16>
    %71 = vector.shape_cast %70 : vector<1x384x128xbf16> to vector<384x128xbf16>
    %cst_36 = arith.constant dense<0.000000e+00> : vector<128x128xf32>
    %72 = tpu.matmul %69, %71, %cst_36 {dimension_numbers = #tpu.dot_dimension_numbers<[1], [0], [0], [1], [0, 0, 1, 1], [], []>} : vector<128x384xbf16>, vector<384x128xbf16>, vector<128x128xf32> -> vector<128x128xf32>
    %73 = arith.addf %68, %72 : vector<128x128xf32>
    %cst_37 = arith.constant dense<0.000000e+00> : vector<128xf32>
    %74 = vector.multi_reduction <add>, %73, %cst_37 [0] : vector<128x128xf32> to vector<128xf32>
    %75 = vector.shape_cast %74 : vector<128xf32> to vector<1x128xf32>
    %76 = vector.shape_cast %75 : vector<1x128xf32> to vector<1x1x128xf32>
    %c0_38 = arith.constant 0 : index
    %c0_39 = arith.constant 0 : index
    %c0_40 = arith.constant 0 : index
    %c0_41 = arith.constant 0 : index
    %77 = vector.load %arg9[%c0_38, %c0_39, %c0_40, %c0_41] : memref<1x1x2x128xf32, #tpu.memory_space<vmem>>, vector<1x1x1x128xf32>
    %78 = vector.shape_cast %77 : vector<1x1x1x128xf32> to vector<1x1x128xf32>
    %79 = vector.shape_cast %76 : vector<1x1x128xf32> to vector<1x1x1x128xf32>
    tpu.vector_store %arg9[%c0_38, %c0_39, %c0_40, %c0_41], %79 {strides = array<i32>} : memref<1x1x2x128xf32, #tpu.memory_space<vmem>>, vector<1x1x1x128xf32>,
    %80 = arith.mulf %73, %73 : vector<128x128xf32>
    %cst_42 = arith.constant dense<0.000000e+00> : vector<128xf32>
    %81 = vector.multi_reduction <add>, %80, %cst_42 [0] : vector<128x128xf32> to vector<128xf32>
    %82 = vector.shape_cast %81 : vector<128xf32> to vector<1x128xf32>
    %83 = vector.shape_cast %82 : vector<1x128xf32> to vector<1x1x128xf32>
    %c0_43 = arith.constant 0 : index
    %c0_44 = arith.constant 0 : index
    %c1_45 = arith.constant 1 : index
    %c0_46 = arith.constant 0 : index
    %84 = vector.load %arg9[%c0_43, %c0_44, %c1_45, %c0_46] : memref<1x1x2x128xf32, #tpu.memory_space<vmem>>, vector<1x1x1x128xf32>
    %85 = vector.shape_cast %84 : vector<1x1x1x128xf32> to vector<1x1x128xf32>
    %86 = vector.shape_cast %83 : vector<1x1x128xf32> to vector<1x1x1x128xf32>
    tpu.vector_store %arg9[%c0_43, %c0_44, %c1_45, %c0_46], %86 {strides = array<i32>} : memref<1x1x2x128xf32, #tpu.memory_space<vmem>>, vector<1x1x1x128xf32>,
    %87 = vector.shape_cast %73 : vector<128x128xf32> to vector<8x16x128xf32>
    %88 = arith.truncf %87 : vector<8x16x128xf32> to vector<8x16x128xbf16>
    %c0_47 = arith.constant 0 : index
    %c0_48 = arith.constant 0 : index
    %c0_49 = arith.constant 0 : index
    %c0_50 = arith.constant 0 : index
    %89 = vector.load %arg8[%c0_47, %c0_48, %c0_49, %c0_50] : memref<1x8x16x128xbf16, #tpu.memory_space<vmem>>, vector<1x8x16x128xbf16>
    %90 = vector.shape_cast %89 : vector<1x8x16x128xbf16> to vector<8x16x128xbf16>
    %91 = vector.shape_cast %88 : vector<8x16x128xbf16> to vector<1x8x16x128xbf16>
    tpu.vector_store %arg8[%c0_47, %c0_48, %c0_49, %c0_50], %91 {strides = array<i32>} : memref<1x8x16x128xbf16, #tpu.memory_space<vmem>>, vector<1x8x16x128xbf16>,
    return
  }
  func.func @transform_0(%arg0: i32, %arg1: i32) -> (i32, i32, i32, i32) {
    %c0_i32 = arith.constant 0 : i32
    %c0_i32_0 = arith.constant 0 : i32
    %c0_i32_1 = arith.constant 0 : i32
    return %arg0, %arg1, %c0_i32, %c0_i32_0 : i32, i32, i32, i32
  }
  func.func @transform_1(%arg0: i32, %arg1: i32) -> (i32, i32, i32, i32) {
    %c8_i32 = arith.constant 8 : i32
    %0 = arith.muli %arg1, %c8_i32 : i32
    %c1_i32 = arith.constant 1 : i32
    %1 = arith.subi %0, %c1_i32 : i32
    %c0_i32 = arith.constant 0 : i32
    %2 = arith.maxsi %1, %c0_i32 : i32
    %c0_i32_0 = arith.constant 0 : i32
    %c0_i32_1 = arith.constant 0 : i32
    %c0_i32_2 = arith.constant 0 : i32
    return %arg0, %2, %c0_i32_0, %c0_i32_1 : i32, i32, i32, i32
  }
  func.func @transform_2(%arg0: i32, %arg1: i32) -> (i32, i32, i32, i32) {
    %c1_i32 = arith.constant 1 : i32
    %0 = arith.addi %arg1, %c1_i32 : i32
    %c8_i32 = arith.constant 8 : i32
    %1 = arith.muli %0, %c8_i32 : i32
    %c15_i32 = arith.constant 15 : i32
    %2 = arith.minsi %1, %c15_i32 : i32
    %c0_i32 = arith.constant 0 : i32
    %c0_i32_0 = arith.constant 0 : i32
    %c0_i32_1 = arith.constant 0 : i32
    return %arg0, %2, %c0_i32, %c0_i32_0 : i32, i32, i32, i32
  }
  func.func @transform_3(%arg0: i32, %arg1: i32) -> (i32, i32, i32) {
    %c0_i32 = arith.constant 0 : i32
    %c0_i32_0 = arith.constant 0 : i32
    %c0_i32_1 = arith.constant 0 : i32
    %c0_i32_2 = arith.constant 0 : i32
    return %c0_i32, %c0_i32_0, %c0_i32_1 : i32, i32, i32
  }
  func.func @transform_4(%arg0: i32, %arg1: i32) -> (i32, i32) {
    %c0_i32 = arith.constant 0 : i32
    %c0_i32_0 = arith.constant 0 : i32
    %c0_i32_1 = arith.constant 0 : i32
    return %c0_i32, %c0_i32_0 : i32, i32
  }
  func.func @transform_5(%arg0: i32, %arg1: i32) -> (i32, i32) {
    %c0_i32 = arith.constant 0 : i32
    %c0_i32_0 = arith.constant 0 : i32
    %c0_i32_1 = arith.constant 0 : i32
    return %c0_i32, %c0_i32_0 : i32, i32
  }
  func.func @transform_6(%arg0: i32, %arg1: i32) -> (i32, i32, i32, i32) {
    %c0_i32 = arith.constant 0 : i32
    %c0_i32_0 = arith.constant 0 : i32
    %c0_i32_1 = arith.constant 0 : i32
    return %arg0, %arg1, %c0_i32, %c0_i32_0 : i32, i32, i32, i32
  }
  func.func @transform_7(%arg0: i32, %arg1: i32) -> (i32, i32, i32, i32) {
    %c0_i32 = arith.constant 0 : i32
    %c0_i32_0 = arith.constant 0 : i32
    %c0_i32_1 = arith.constant 0 : i32
    return %arg0, %arg1, %c0_i32, %c0_i32_0 : i32, i32, i32, i32
  }
}

module attributes {stable_mosaic.version = 11 : i64} {
  func.func @bn_relu_pool_kernel(%arg0: i32, %arg1: i32, %arg2: memref<1x8x8x256xbf16, #tpu.memory_space<vmem>>, %arg3: memref<1x1x256xf32, #tpu.memory_space<vmem>>, %arg4: memref<1x1x256xf32, #tpu.memory_space<vmem>>, %arg5: memref<1x4x8x128xf32, #tpu.memory_space<vmem>>) attributes {dimension_semantics = [#tpu.dimension_semantics<parallel>, #tpu.dimension_semantics<parallel>], iteration_bounds = array<i64: 2, 2>, scalar_prefetch = 0 : i64, scratch_operands = 0 : i64, tpu.core_type = #tpu.core_type<tc>, window_params = [{transform_indices = @transform_0, window_bounds = array<i64: 1, 8, 8, 256>}, {pipeline_mode = #tpu.pipeline_mode<synchronous>, transform_indices = @transform_1, window_bounds = array<i64: 1, 1, 256>}, {pipeline_mode = #tpu.pipeline_mode<synchronous>, transform_indices = @transform_2, window_bounds = array<i64: 1, 1, 256>}, {transform_indices = @transform_3, window_bounds = array<i64: 1, 4, 8, 128>}]} {
    %c0 = arith.constant 0 : index
    %c0_0 = arith.constant 0 : index
    %c0_1 = arith.constant 0 : index
    %c0_2 = arith.constant 0 : index
    %0 = vector.load %arg2[%c0, %c0_0, %c0_1, %c0_2] : memref<1x8x8x256xbf16, #tpu.memory_space<vmem>>, vector<1x8x8x256xbf16>
    %1 = vector.shape_cast %0 : vector<1x8x8x256xbf16> to vector<8x8x256xbf16>
    %2 = arith.extf %1 : vector<8x8x256xbf16> to vector<8x8x256xf32>
    %c0_3 = arith.constant 0 : index
    %c0_4 = arith.constant 0 : index
    %c0_5 = arith.constant 0 : index
    %3 = vector.load %arg3[%c0_3, %c0_4, %c0_5] : memref<1x1x256xf32, #tpu.memory_space<vmem>>, vector<1x1x256xf32>
    %4 = vector.broadcast %3 : vector<1x1x256xf32> to vector<8x8x256xf32>
    %5 = arith.mulf %2, %4 : vector<8x8x256xf32>
    %c0_6 = arith.constant 0 : index
    %c0_7 = arith.constant 0 : index
    %c0_8 = arith.constant 0 : index
    %6 = vector.load %arg4[%c0_6, %c0_7, %c0_8] : memref<1x1x256xf32, #tpu.memory_space<vmem>>, vector<1x1x256xf32>
    %7 = vector.broadcast %6 : vector<1x1x256xf32> to vector<8x8x256xf32>
    %8 = arith.addf %5, %7 : vector<8x8x256xf32>
    %cst = arith.constant 0.000000e+00 : f32
    %9 = vector.broadcast %cst : f32 to vector<8x8x256xf32>
    %10 = arith.maximumf %8, %9 : vector<8x8x256xf32>
    %11 = vector.extract_strided_slice %10 {offsets = [0, 0, 0], sizes = [8, 8, 128], strides = [1, 1, 1]} : vector<8x8x256xf32> to vector<8x8x128xf32>
    %12 = vector.extract_strided_slice %10 {offsets = [0, 0, 128], sizes = [8, 8, 128], strides = [1, 1, 1]} : vector<8x8x256xf32> to vector<8x8x128xf32>
    %13 = arith.addf %11, %12 : vector<8x8x128xf32>
    %14 = vector.shape_cast %13 : vector<8x8x128xf32> to vector<4x2x8x128xf32>
    %cst_9 = arith.constant dense<0.000000e+00> : vector<4x8x128xf32>
    %15 = vector.multi_reduction <add>, %14, %cst_9 [1] : vector<4x2x8x128xf32> to vector<4x8x128xf32>
    %cst_10 = arith.constant 2.500000e-01 : f32
    %16 = vector.broadcast %cst_10 : f32 to vector<4x8x128xf32>
    %17 = arith.mulf %16, %15 : vector<4x8x128xf32>
    %c0_11 = arith.constant 0 : index
    %c0_12 = arith.constant 0 : index
    %c0_13 = arith.constant 0 : index
    %c0_14 = arith.constant 0 : index
    %18 = vector.load %arg5[%c0_11, %c0_12, %c0_13, %c0_14] : memref<1x4x8x128xf32, #tpu.memory_space<vmem>>, vector<1x4x8x128xf32>
    %19 = vector.shape_cast %18 : vector<1x4x8x128xf32> to vector<4x8x128xf32>
    %20 = vector.shape_cast %17 : vector<4x8x128xf32> to vector<1x4x8x128xf32>
    tpu.vector_store %arg5[%c0_11, %c0_12, %c0_13, %c0_14], %20 {strides = array<i32>} : memref<1x4x8x128xf32, #tpu.memory_space<vmem>>, vector<1x4x8x128xf32>,
    return
  }
  func.func @transform_0(%arg0: i32, %arg1: i32) -> (i32, i32, i32, i32) {
    %c0_i32 = arith.constant 0 : i32
    %c0_i32_0 = arith.constant 0 : i32
    %c0_i32_1 = arith.constant 0 : i32
    return %arg0, %arg1, %c0_i32, %c0_i32_0 : i32, i32, i32, i32
  }
  func.func @transform_1(%arg0: i32, %arg1: i32) -> (i32, i32, i32) {
    %c0_i32 = arith.constant 0 : i32
    %c0_i32_0 = arith.constant 0 : i32
    %c0_i32_1 = arith.constant 0 : i32
    %c0_i32_2 = arith.constant 0 : i32
    return %c0_i32, %c0_i32_0, %c0_i32_1 : i32, i32, i32
  }
  func.func @transform_2(%arg0: i32, %arg1: i32) -> (i32, i32, i32) {
    %c0_i32 = arith.constant 0 : i32
    %c0_i32_0 = arith.constant 0 : i32
    %c0_i32_1 = arith.constant 0 : i32
    %c0_i32_2 = arith.constant 0 : i32
    return %c0_i32, %c0_i32_0, %c0_i32_1 : i32, i32, i32
  }
  func.func @transform_3(%arg0: i32, %arg1: i32) -> (i32, i32, i32, i32) {
    %c0_i32 = arith.constant 0 : i32
    %c0_i32_0 = arith.constant 0 : i32
    %c0_i32_1 = arith.constant 0 : i32
    return %arg0, %arg1, %c0_i32, %c0_i32_0 : i32, i32, i32, i32
  }
}

</mosaic_0001>

<bundles_post_ra>
// kernel: conv_block_forward.3
= control target key start
LH: loop header
LB: loop body
LE: loop exit
PB: predicated region body
PF: predicated region fallthrough
CT: control target
= control target key end

     0   :  { %s992_s12 = smov 0   ;;  %s994_s13 = smov 0   ;;  %s1082_s0 = inlined_call_operand.vmem [shape: bf16[2,16,16,36], index: 0, kind: input, shape index: {}]   ;;  %s1083_s1 = inlined_call_operand.vmem [shape: bf16[36,128], index: 1, kind: input, shape index: {}]   ;;  %s1084_s2 = inlined_call_operand.vmem [shape: bf16[2,16,16,128], index: 2, kind: output, shape index: {0}]   ;;  %s1085_s3 = inlined_call_operand.vmem [shape: f32[2,2,2,128], index: 3, kind: output, shape index: {1}]  }
   0x1   :  { %s996_s14 = smov 0   ;;  %s998_s15 = smov 0  }
   0x2   :  { %s1000_s16 = smov 0  }
   0x3 LB: > { %s23_s17 = sadd.s32 1, %s962_s14  ;;  %s26_s18 = sadd.s32 1, %s966_s15  ;;  %s970_s16 = sphi %s1000_s16, %s14_s16   ;;  %s966_s15 = sphi %s998_s15, %s1089_s15   ;;  %s962_s14 = sphi %s996_s14, %s1088_s14   ;;  %s958_s13 = sphi %s994_s13, %s1087_s13   ;;  %s954_s12 = sphi %s992_s12, %s1086_s12  }
   0x4   : > { %p24_p0 = scmp.ge.s32.totalorder %s23_s17, 2  ;;  %p729_p1 = scmp.ge.s32.totalorder %s970_s16, 1 }
   0x5   : > { %p164_p2 = scmp.lt.s32.totalorder %s970_s16, 5 }
   0x6   : > { %s1091_s17 = smov (%p24_p0, %s23_s17), 0  ;;  %s1093_s18 = smov (!%p24_p0, %s26_s18), %s966_s15 }
   0x7   : > { %p165_p3 = pnand %p729_p1, %p164_p2  ;;  %p28_p4 = scmp.ge.s32.totalorder %s1093_s18, 2 }
   0x8   : > { %s730_s23 = sshll.u32 (!%p165_p3), %s954_s12, 3  ;;  %p207_p5 = scmp.lt.s32.totalorder (!%p165_p3), %s958_s13, 1 }
   0x9   : > { %s1095_s18 = smov (%p28_p4, %s1093_s18), 0  ;;  %168 = sbr.rel (%p165_p3) target bundleno = 271 (0x10f), region = 28 }
   0xa   : > { %p209_p6 = scmp.lt.s32.totalorder (!%p165_p3), %s730_s23, 15  ;;  %p230_p7 = scmp.lt.s32.totalorder (!%p165_p3), %s954_s12, 1 }
   0xe   : > { %v921_v0 = vld [vmem:[%s1083_s1 + $0x10] ss:$0 sps:$4 sm:$0x33]   ;;  %vm338_vm0 = vcmask 1041408   ;;  %v922_v1 = vld [vmem:[%s1083_s1 + $0x8] sm:$0xff]   ;;  %v923_v3 = vld [vmem:[%s1083_s1] sm:$0xff]  }
   0xf   : > { %879 = vmatprep.subr.msk.bf16.mxu0 %vm338_vm0, %v921_v0  ;;  %v340_v2 = vsel %vm338_vm0, %v921_v0, 0  ;;  %880 = vmatprep.subr.msk.bf16.mxu1 %vm338_vm0, %v921_v0  ;;  %s1097_s13 = smov (!%p207_p5, %s958_s13), 1  ;;  %s1099_s23 = smov (!%p209_p6, %s730_s23), 15  ;;  %vm313_vm1 = vcmask 293888  }
  0x10   : > { %852 = vmatpush3.bf16.msra.mxu0 %v340_v2  ;;  %876 = vmatpush3.bf16.msra.mxu1 %v340_v2  ;;  %s732_s26 = sshll.u32 %s1097_s13, 5  ;;  %s731_s27 = sshll.u32 %s1099_s23, 1 }
  0x11   : > { %853 = vmatprep.subr.bf16.mxu0 %v922_v1  ;;  %874 = vmatprep.subr.bf16.mxu1 %v922_v1  ;;  %s213_s28 = sadd.s32 %s732_s26, %s731_s27  ;;  %s1101_s12 = smov (!%p230_p7, %s954_s12), 1 }
  0x12   : > { %s733_s29 = sshll.u32 %s213_s28, 2  ;;  %s738_s9 = sshll.u32 %s1097_s13, 1 }
  0x13   : > { %s215_s5 = scalar_lea.vmem %s1082_s0, %s733_s29  ;;  %s1051_s8 = scalar_lea.vmem %s1084_s2, %s733_s29 }
  0x14   : > { %854 = vmatpush3.bf16.msra.mxu0 %v922_v1  ;;  %877 = vmatpush3.bf16.msra.mxu1 %v922_v1  ;;  %v924_v4 = vld [vmem:[%s215_s5] sm:$0xff]   ;;  %v925_v5 = vld [vmem:[%s215_s5 + $0x8] sm:$0xff]   ;;  %v926_v6 = vld [vmem:[%s215_s5 + $0x10] sm:$0xff]   ;;  %s233_s10 = sadd.s32 %s738_s9, %s1101_s12 }
  0x15   : > { %855 = vmatprep.subr.bf16.mxu0 %v923_v3  ;;  %875 = vmatprep.subr.bf16.mxu1 %v923_v3  ;;  %v928_v7 = vld [vmem:[%s215_s5 + $0x20] sm:$0xff]   ;;  %v929_v8 = vld [vmem:[%s215_s5 + $0x28] sm:$0xff]   ;;  %v930_v9 = vld [vmem:[%s215_s5 + $0x30] sm:$0xff]   ;;  %s739_s11 = sshll.u32 %s233_s10, 1 }
  0x16   : > { %857 = vmatprep.mubr.msk.bf16.mxu0 %vm313_vm1, %v924_v4  ;;  %865 = vmatprep.mubr.msk.bf16.mxu1 %vm313_vm1, %v928_v7  ;;  %v927_v10 = vld [vmem:[%s215_s5 + $0x18] sm:$0xff]   ;;  %s235_s21 = scalar_lea.vmem %s1085_s3, %s739_s11 }
  0x17   : > { %v931_v11 = vld [vmem:[%s215_s5 + $0x38] sm:$0xff]  }
  0x18   : > { %856 = vmatpush3.bf16.msra.mxu0 %v923_v3  ;;  %878 = vmatpush3.bf16.msra.mxu1 %v923_v3 }
  0x1b   : > { %858 = vmatmul.mubr.msk.bf16.vlgmr.msra.gmra.mxu0 %vm313_vm1, %v925_v5  ;;  %866 = vmatmul.mubr.msk.bf16.vlgmr.msra.gmra.mxu1 %vm313_vm1, %v929_v8 }
  0x1c   : > { %861 = vmatprep.mubr.msk.bf16.mxu0 %vm313_vm1, %v926_v6  ;;  %869 = vmatprep.mubr.msk.bf16.mxu1 %vm313_vm1, %v930_v9 }
  0x23   : > { %862 = vmatmul.mubr.msk.bf16.gmra.mxu0 %vm313_vm1, %v927_v10  ;;  %870 = vmatmul.mubr.msk.bf16.gmra.mxu1 %vm313_vm1, %v931_v11 }
  0xdb   : > { %v859_v12 = vpop.f32.mrf.mxu0  ;;  %v867_v15 = vpop.f32.mrf.mxu1 }
  0xdc   : > { %v463_v25 = vmul.f32 %v859_v12, %v859_v12  ;;  %v471_v63 = vmul.f32 %v867_v15, %v867_v15 }
  0xdd   : > { %v376_v13 = vpop.f32.mrf.mxu0  ;;  %v408_v18 = vpop.f32.mrf.mxu1 }
  0xde   : > { %v461_v19 = vmul.f32 %v376_v13, %v376_v13  ;;  %v469_v57 = vmul.f32 %v408_v18, %v408_v18 }
  0xdf   : > { %v860_v14 = vpop.f32.mrf.mxu0  ;;  %v868_v24 = vpop.f32.mrf.mxu1 }
  0xe0   : > { %v801_v16 = vpack.c.bf16 %v860_v14, %v859_v12  ;;  %v821_v29 = vpack.c.bf16 %v868_v24, %v867_v15  ;;  %v464_v31 = vmul.f32 %v860_v14, %v860_v14  ;;  %v472_v2 = vmul.f32 %v868_v24, %v868_v24 }
  0xe1   : > { %v379_v17 = vpop.f32.mrf.mxu0  ;;  %v411_v30 = vpop.f32.mrf.mxu1 }
  0xe2   : > { %833 = vst [vmem:[%s1051_s8 + $0x8] sm:$0xff] %v801_v16   ;;  %v439_v20 = vadd.f32 %v379_v17, %v376_v13  ;;  %v462_v21 = vmul.f32 %v379_v17, %v379_v17  ;;  %v796_v22 = vpack.c.bf16 %v379_v17, %v376_v13  ;;  %837 = vst [vmem:[%s1051_s8 + $0x28] sm:$0xff] %v821_v29  }
  0xe3   : > { %v863_v23 = vpop.f32.mrf.mxu0  ;;  %v816_v35 = vpack.c.bf16 %v411_v30, %v408_v18  ;;  %v871_v36 = vpop.f32.mrf.mxu1  ;;  %v470_v61 = vmul.f32 %v411_v30, %v411_v30 }
  0xe4   : > { %v440_v26 = vadd.f32 %v859_v12, %v439_v20  ;;  %v477_v27 = vadd.f32 %v462_v21, %v461_v19  ;;  %797 = vst [vmem:[%s1051_s8] sm:$0xff] %v796_v22   ;;  %v467_v48 = vmul.f32 %v863_v23, %v863_v23  ;;  %v475_v11 = vmul.f32 %v871_v36, %v871_v36 }
  0xe5   : > { %v392_v28 = vpop.f32.mrf.mxu0  ;;  %836 = vst [vmem:[%s1051_s8 + $0x20] sm:$0xff] %v816_v35   ;;  %v424_v42 = vpop.f32.mrf.mxu1 }
  0xe6   : > { %v478_v32 = vadd.f32 %v477_v27, %v463_v25  ;;  %v441_v33 = vadd.f32 %v860_v14, %v440_v26  ;;  %v465_v38 = vmul.f32 %v392_v28, %v392_v28  ;;  %v473_v6 = vmul.f32 %v424_v42, %v424_v42 }
  0xe7   : > { %v864_v34 = vpop.f32.mrf.mxu0  ;;  %v872_v47 = vpop.f32.mrf.mxu1 }
  0xe8   : > { %v442_v37 = vadd.f32 %v441_v33, %v392_v28  ;;  %v479_v39 = vadd.f32 %v478_v32, %v464_v31  ;;  %v811_v40 = vpack.c.bf16 %v864_v34, %v863_v23  ;;  %v831_v51 = vpack.c.bf16 %v872_v47, %v871_v36 }
  0xe9   : > { %v395_v41 = vpop.f32.mrf.mxu0  ;;  %v427_v52 = vpop.f32.mrf.mxu1  ;;  %v468_v53 = vmul.f32 %v864_v34, %v864_v34  ;;  %v476_v14 = vmul.f32 %v872_v47, %v872_v47 }
  0xea   : > { %v480_v43 = vadd.f32 %v479_v39, %v465_v38  ;;  %835 = vst [vmem:[%s1051_s8 + $0x18] sm:$0xff] %v811_v40   ;;  %v443_v44 = vadd.f32 %v442_v37, %v395_v41  ;;  %v466_v45 = vmul.f32 %v395_v41, %v395_v41  ;;  %v806_v46 = vpack.c.bf16 %v395_v41, %v392_v28 }
  0xeb   : > { %839 = vst [vmem:[%s1051_s8 + $0x38] sm:$0xff] %v831_v51   ;;  %v826_v56 = vpack.c.bf16 %v427_v52, %v424_v42  ;;  %v474_v10 = vmul.f32 %v427_v52, %v427_v52 }
  0xec   : > { %v444_v49 = vadd.f32 %v863_v23, %v443_v44  ;;  %v481_v50 = vadd.f32 %v480_v43, %v466_v45  ;;  %834 = vst [vmem:[%s1051_s8 + $0x10] sm:$0xff] %v806_v46  }
  0xed   : > { %838 = vst [vmem:[%s1051_s8 + $0x30] sm:$0xff] %v826_v56  }
  0xee   : > { %v445_v54 = vadd.f32 %v864_v34, %v444_v49  ;;  %v482_v55 = vadd.f32 %v481_v50, %v467_v48 }
  0xf0   : > { %v483_v58 = vadd.f32 %v482_v55, %v468_v53  ;;  %v446_v59 = vadd.f32 %v445_v54, %v408_v18 }
  0xf2   : > { %v447_v60 = vadd.f32 %v446_v59, %v411_v30  ;;  %v484_v62 = vadd.f32 %v483_v58, %v469_v57 }
  0xf4   : > { %v448_v0 = vadd.f32 %v867_v15, %v447_v60  ;;  %v485_v1 = vadd.f32 %v484_v62, %v470_v61 }
  0xf6   : > { %v486_v3 = vadd.f32 %v485_v1, %v471_v63  ;;  %v449_v4 = vadd.f32 %v868_v24, %v448_v0 }
  0xf8   : > { %v450_v5 = vadd.f32 %v449_v4, %v424_v42  ;;  %v487_v7 = vadd.f32 %v486_v3, %v472_v2 }
  0xfa   : > { %v488_v8 = vadd.f32 %v487_v7, %v473_v6  ;;  %v451_v9 = vadd.f32 %v450_v5, %v427_v52 }
  0xfc   : > { %v452_v12 = vadd.f32 %v871_v36, %v451_v9  ;;  %v489_v13 = vadd.f32 %v488_v8, %v474_v10 }
  0xfe   : > { %v453_v16 = vadd.f32 %v872_v47, %v452_v12  ;;  %v490_v17 = vadd.f32 %v489_v13, %v475_v11 }
 0x100   : > { %v454_v15 = vrot.slane %v453_v16, 4  ;;  %v491_v18 = vadd.f32 %v490_v17, %v476_v14 }
 0x102   : > { %v455_v19 = vadd.f32 %v454_v15, %v453_v16  ;;  %v492_v20 = vrot.slane %v491_v18, 4 }
 0x104   : > { %v456_v21 = vrot.slane %v455_v19, 2  ;;  %v493_v22 = vadd.f32 %v492_v20, %v491_v18 }
 0x106   : > { %v457_v23 = vadd.f32 %v456_v21, %v455_v19  ;;  %v494_v24 = vrot.slane %v493_v22, 2 }
 0x108   : > { %v458_v25 = vrot.slane %v457_v23, 1  ;;  %v495_v26 = vadd.f32 %v494_v24, %v493_v22 }
 0x10a   : > { %v459_v27 = vadd.f32 %v458_v25, %v457_v23  ;;  %v496_v28 = vrot.slane %v495_v26, 1 }
 0x10c   : > { %460 = vst [vmem:[%s235_s21] sm:$0x1] %v459_v27  ;;  %v497_v29 = vadd.f32 %v496_v28, %v495_v26 }
 0x10e   : > { %498 = vst [vmem:[%s235_s21 + $0x1] sm:$0x1] %v497_v29 }
 0x10f PF: > { %s14_s16 = sadd.s32 1, %s970_s16   ;;  %s1086_s12 = smov %s962_s14 }
 0x110   : > { %p11_p8 = scmp.ge.s32.totalorder %s14_s16, 6   ;;  %s1087_s13 = smov %s966_s15 }
 0x111   : > { %s1088_s14 = smov %s1091_s17  ;;  %s1089_s15 = smov %s1095_s18 }
 0x112   :  { %13 = sbr.rel (!%p11_p8) target bundleno = 3 (0x3), region = 70 }

// kernel: conv_block_forward.5
= control target key start
LH: loop header
LB: loop body
LE: loop exit
PB: predicated region body
PF: predicated region fallthrough
CT: control target
= control target key end

     0   :  { %s536_s12 = smov 0   ;;  %s538_s13 = smov 0   ;;  %s666_s0 = inlined_call_operand.vmem [shape: bf16[2,16,8,256], index: 0, kind: input, shape index: {}]   ;;  %s667_s1 = inlined_call_operand.vmem [shape: f32[1,1,256], index: 1, kind: input, shape index: {}]   ;;  %s668_s2 = inlined_call_operand.vmem [shape: f32[1,1,256], index: 2, kind: input, shape index: {}]   ;;  %s669_s3 = inlined_call_operand.vmem [shape: f32[2,8,8,128], index: 3, kind: output, shape index: {}]  }
   0x1   :  { %s540_s14 = smov 0   ;;  %s542_s15 = smov 0  }
   0x2   :  { %s544_s16 = smov 0  }
   0x3 LB: > { %s22_s17 = sadd.s32 1, %s506_s14  ;;  %s25_s18 = sadd.s32 1, %s510_s15  ;;  %s514_s16 = sphi %s544_s16, %s13_s16   ;;  %s510_s15 = sphi %s542_s15, %s674_s15   ;;  %s506_s14 = sphi %s540_s14, %s673_s14   ;;  %s502_s13 = sphi %s538_s13, %s672_s13   ;;  %s498_s12 = sphi %s536_s12, %s671_s12  }
   0x4   : > { %p23_p0 = scmp.ge.s32.totalorder %s22_s17, 2  ;;  %p426_p1 = scmp.ge.s32.totalorder %s514_s16, 1 }
   0x5   : > { %p159_p2 = scmp.lt.s32.totalorder %s514_s16, 5 }
   0x6   : > { %s676_s17 = smov (%p23_p0, %s22_s17), 0  ;;  %s678_s18 = smov (!%p23_p0, %s25_s18), %s510_s15 }
   0x7   : > { %p160_p3 = pnand %p426_p1, %p159_p2  ;;  %p27_p4 = scmp.ge.s32.totalorder %s678_s18, 2 }
   0x8   : > { %s427_s19 = sshll.u32 (!%p160_p3), %s498_s12, 3  ;;  %p193_p5 = scmp.lt.s32.totalorder (!%p160_p3), %s502_s13, 1 }
   0x9   : > { %s680_s18 = smov (%p27_p4, %s678_s18), 0  ;;  %163 = sbr.rel (%p160_p3) target bundleno = 49 (0x31), region = 32 }
   0xa   : > { %p195_p6 = scmp.lt.s32.totalorder (!%p160_p3), %s427_s19, 15  ;;  %s431_s21 = sshll.u32 (!%p160_p3), %s498_s12, 2 }
   0xb   : > { %p579_p7 = scmp.lt.s32.totalorder (!%p160_p3), %s431_s21, 7 }
   0xe   : > { %v239_v0 = vlaneseq  ;;  %s682_s13 = smov (!%p193_p5, %s502_s13), 1  ;;  %s684_s19 = smov (!%p195_p6, %s427_s19), 15  ;;  %v237_v4 = vld [vmem:[%s667_s1] sm:$0x3] }
   0xf   : > { %s429_s20 = sshll.u32 %s682_s13, 5  ;;  %s428_s22 = sshll.u32 %s684_s19, 1  ;;  %v265_v5 = vld [vmem:[%s668_s2] sm:$0x3] }
  0x10   : > { %v240_v1 = vshrl.u32 %v239_v0, 7  ;;  %s199_s25 = sadd.s32 %s429_s20, %s428_s22  ;;  %s686_s21 = smov (!%p579_p7, %s431_s21), 7 }
  0x11   : > { %s430_s28 = sshll.u32 %s199_s25, 2  ;;  %s432_s6 = sshll.u32 %s682_s13, 3 }
  0x12   : > { %v241_v2 = vsub.s32 0, %v240_v1  ;;  %v245_v3 = vsub.s32 1, %v240_v1  ;;  %s586_s5 = scalar_lea.vmem %s666_s0, %s430_s28  ;;  %s615_s7 = sadd.s32 %s432_s6, %s686_s21 }
  0x13   : > { %v213_v8 = vld [vmem:[%s586_s5] sm:$0xff]  ;;  %v214_v9 = vld [vmem:[%s586_s5 + $0x8] sm:$0xff]  ;;  %v215_v12 = vld [vmem:[%s586_s5 + $0x10] sm:$0xff]  ;;  %s433_s8 = sshll.u32 %s615_s7, 3 }
  0x14   : > { %v588_v6 = vrot.slane %v237_v4, %v241_v2  ;;  %v590_v7 = vrot.slane %v237_v4, %v245_v3  ;;  %v594_v10 = vrot.slane %v265_v5, %v241_v2  ;;  %v596_v11 = vrot.slane %v265_v5, %v245_v3  ;;  %v216_v17 = vld [vmem:[%s586_s5 + $0x18] sm:$0xff]  ;;  %v217_v38 = vld [vmem:[%s586_s5 + $0x20] sm:$0xff]  ;;  %v218_v43 = vld [vmem:[%s586_s5 + $0x28] sm:$0xff]  ;;  %s631_s11 = scalar_lea.vmem %s669_s3, %s433_s8 }
  0x15   : > { %v221_v13 = vunpack.c.l.bf16 %v213_v8  ;;  %v222_v14 = vunpack.c.h.bf16 %v213_v8  ;;  %v223_v15 = vunpack.c.l.bf16 %v214_v9  ;;  %v224_v16 = vunpack.c.h.bf16 %v214_v9  ;;  %v219_v48 = vld [vmem:[%s586_s5 + $0x30] sm:$0xff]  ;;  %v220_v57 = vld [vmem:[%s586_s5 + $0x38] sm:$0xff] }
  0x16   : > { %v225_v18 = vunpack.c.l.bf16 %v215_v12  ;;  %v226_v19 = vunpack.c.h.bf16 %v215_v12  ;;  %v227_v20 = vunpack.c.l.bf16 %v216_v17  ;;  %v228_v21 = vunpack.c.h.bf16 %v216_v17 }
  0x17   : > { %v249_v22 = vmul.f32 %v588_v6, %v221_v13  ;;  %v250_v23 = vmul.f32 %v590_v7, %v222_v14  ;;  %v251_v24 = vmul.f32 %v588_v6, %v223_v15  ;;  %v252_v25 = vmul.f32 %v590_v7, %v224_v16 }
  0x18   : > { %v253_v26 = vmul.f32 %v588_v6, %v225_v18  ;;  %v254_v27 = vmul.f32 %v590_v7, %v226_v19  ;;  %v255_v28 = vmul.f32 %v588_v6, %v227_v20  ;;  %v256_v29 = vmul.f32 %v590_v7, %v228_v21 }
  0x19   : > { %v277_v30 = vadd.f32 %v594_v10, %v249_v22  ;;  %v278_v31 = vadd.f32 %v596_v11, %v250_v23  ;;  %v279_v32 = vadd.f32 %v594_v10, %v251_v24  ;;  %v280_v33 = vadd.f32 %v596_v11, %v252_v25 }
  0x1a   : > { %v281_v34 = vadd.f32 %v594_v10, %v253_v26  ;;  %v282_v35 = vadd.f32 %v596_v11, %v254_v27  ;;  %v283_v36 = vadd.f32 %v594_v10, %v255_v28  ;;  %v284_v37 = vadd.f32 %v596_v11, %v256_v29 }
  0x1b   : > { %v293_v39 = vmax.f32 %v277_v30, 0.0  ;;  %v294_v40 = vmax.f32 %v278_v31, 0.0  ;;  %v295_v41 = vmax.f32 %v279_v32, 0.0  ;;  %v296_v42 = vmax.f32 %v280_v33, 0.0 }
  0x1c   : > { %v297_v44 = vmax.f32 %v281_v34, 0.0  ;;  %v298_v45 = vmax.f32 %v282_v35, 0.0  ;;  %v299_v46 = vmax.f32 %v283_v36, 0.0  ;;  %v300_v47 = vmax.f32 %v284_v37, 0.0 }
  0x1d   : > { %v309_v49 = vadd.f32 %v294_v40, %v293_v39  ;;  %v310_v50 = vadd.f32 %v296_v42, %v295_v41  ;;  %v229_v51 = vunpack.c.l.bf16 %v217_v38  ;;  %v230_v52 = vunpack.c.h.bf16 %v217_v38 }
  0x1e   : > { %v311_v53 = vadd.f32 %v298_v45, %v297_v44  ;;  %v312_v54 = vadd.f32 %v300_v47, %v299_v46  ;;  %v231_v55 = vunpack.c.l.bf16 %v218_v43  ;;  %v232_v56 = vunpack.c.h.bf16 %v218_v43 }
  0x1f   : > { %v317_v58 = vadd.f32 %v310_v50, %v309_v49  ;;  %v257_v59 = vmul.f32 %v588_v6, %v229_v51  ;;  %v258_v60 = vmul.f32 %v590_v7, %v230_v52  ;;  %v233_v61 = vunpack.c.l.bf16 %v219_v48 }
  0x20   : > { %v318_v62 = vadd.f32 %v312_v54, %v311_v53  ;;  %v259_v63 = vmul.f32 %v588_v6, %v231_v55  ;;  %v260_v0 = vmul.f32 %v590_v7, %v232_v56  ;;  %v234_v1 = vunpack.c.h.bf16 %v219_v48 }
  0x21   : > { %v321_v2 = vmul.f32 0.25, %v317_v58  ;;  %v285_v3 = vadd.f32 %v594_v10, %v257_v59  ;;  %v286_v4 = vadd.f32 %v596_v11, %v258_v60  ;;  %v235_v5 = vunpack.c.l.bf16 %v220_v57 }
  0x22   : > { %v322_v8 = vmul.f32 0.25, %v318_v62  ;;  %v287_v9 = vadd.f32 %v594_v10, %v259_v63  ;;  %v288_v12 = vadd.f32 %v596_v11, %v260_v0  ;;  %v236_v13 = vunpack.c.h.bf16 %v220_v57 }
  0x23   : > { %325 = vst [vmem:[%s631_s11] sm:$0xff] %v321_v2  ;;  %v301_v14 = vmax.f32 %v285_v3, 0.0  ;;  %v302_v15 = vmax.f32 %v286_v4, 0.0  ;;  %v261_v16 = vmul.f32 %v588_v6, %v233_v61  ;;  %v262_v17 = vmul.f32 %v590_v7, %v234_v1 }
  0x24   : > { %326 = vst [vmem:[%s631_s11 + $0x8] sm:$0xff] %v322_v8  ;;  %v303_v18 = vmax.f32 %v287_v9, 0.0  ;;  %v304_v19 = vmax.f32 %v288_v12, 0.0  ;;  %v263_v20 = vmul.f32 %v588_v6, %v235_v5  ;;  %v264_v21 = vmul.f32 %v590_v7, %v236_v13 }
  0x25   : > { %v313_v22 = vadd.f32 %v302_v15, %v301_v14  ;;  %v289_v23 = vadd.f32 %v594_v10, %v261_v16  ;;  %v290_v24 = vadd.f32 %v596_v11, %v262_v17 }
  0x26   : > { %v314_v25 = vadd.f32 %v304_v19, %v303_v18  ;;  %v291_v26 = vadd.f32 %v594_v10, %v263_v20  ;;  %v292_v27 = vadd.f32 %v596_v11, %v264_v21 }
  0x27   : > { %v305_v28 = vmax.f32 %v289_v23, 0.0  ;;  %v306_v29 = vmax.f32 %v290_v24, 0.0 }
  0x28   : > { %v319_v30 = vadd.f32 %v314_v25, %v313_v22  ;;  %v307_v31 = vmax.f32 %v291_v26, 0.0  ;;  %v308_v32 = vmax.f32 %v292_v27, 0.0 }
  0x29   : > { %v315_v6 = vadd.f32 %v306_v29, %v305_v28 }
  0x2a   : > { %v323_v33 = vmul.f32 0.25, %v319_v30  ;;  %v316_v34 = vadd.f32 %v308_v32, %v307_v31 }
  0x2c   : > { %327 = vst [vmem:[%s631_s11 + $0x10] sm:$0xff] %v323_v33  ;;  %v320_v7 = vadd.f32 %v316_v34, %v315_v6 }
  0x2e   : > { %v324_v35 = vmul.f32 0.25, %v320_v7 }
  0x30   : > { %328 = vst [vmem:[%s631_s11 + $0x18] sm:$0xff] %v324_v35 }
  0x31 PF: > { %s13_s16 = sadd.s32 1, %s514_s16   ;;  %s671_s12 = smov %s506_s14 }
  0x32   : > { %p10_p8 = scmp.ge.s32.totalorder %s13_s16, 6   ;;  %s672_s13 = smov %s510_s15 }
  0x33   : > { %s673_s14 = smov %s676_s17  ;;  %s674_s15 = smov %s680_s18 }
  0x34   :  { %12 = sbr.rel (!%p10_p8) target bundleno = 3 (0x3), region = 62 }

// kernel: conv_block_forward.4
= control target key start
LH: loop header
LB: loop body
LE: loop exit
PB: predicated region body
PF: predicated region fallthrough
CT: control target
= control target key end

     0   :  { %s3764_s24 = smov 0   ;;  %s3766_s25 = smov 0   ;;  %s4968_s0 = inlined_call_operand.vmem [shape: bf16[2,16,16,128], index: 0, kind: input, shape index: {}, may-alias: {0,1,2}]   ;;  %s4969_s1 = inlined_call_operand.vmem [shape: bf16[2,16,16,128], index: 1, kind: input, shape index: {}, may-alias: {0,1,2}]   ;;  %s4970_s2 = inlined_call_operand.vmem [shape: bf16[2,16,16,128], index: 2, kind: input, shape index: {}, may-alias: {0,1,2}]   ;;  %s4971_s3 = inlined_call_operand.vmem [shape: bf16[3,384,128], index: 3, kind: input, shape index: {}]   ;;  %s4972_s4 = inlined_call_operand.vmem [shape: f32[1,128], index: 4, kind: input, shape index: {}]   ;;  %s4973_s5 = inlined_call_operand.vmem [shape: f32[1,128], index: 5, kind: input, shape index: {}]   ;;  %s4974_s6 = inlined_call_operand.vmem [shape: bf16[2,16,16,128], index: 6, kind: output, shape index: {0}]   ;;  %s4975_s7 = inlined_call_operand.vmem [shape: f32[2,2,2,128], index: 7, kind: output, shape index: {1}]  }
   0x1   :  { %s3768_s26 = smov 0   ;;  %s3770_s27 = smov 0  }
   0x2   :  { %s3772_s28 = smov 0  }
   0x3 LB: > { %s27_s29 = sadd.s32 1, %s3713_s26  ;;  %s30_s30 = sadd.s32 1, %s3717_s27  ;;  %s3721_s28 = sphi %s3772_s28, %s18_s28   ;;  %s3717_s27 = sphi %s3770_s27, %s5096_s27   ;;  %s3713_s26 = sphi %s3768_s26, %s5095_s26   ;;  %s3709_s25 = sphi %s3766_s25, %s5094_s25   ;;  %s3705_s24 = sphi %s3764_s24, %s5093_s24  }
   0x4   : > { %p28_p0 = scmp.ge.s32.totalorder %s27_s29, 2  ;;  %p2678_p1 = scmp.ge.s32.totalorder %s3721_s28, 1 }
   0x5   : > { %p328_p2 = scmp.lt.s32.totalorder %s3721_s28, 5 }
   0x6   : > { %s5098_s29 = smov (%p28_p0, %s27_s29), 0  ;;  %s5100_s30 = smov (!%p28_p0, %s30_s30), %s3717_s27 }
   0x7   : > { %p329_p3 = pnand %p2678_p1, %p328_p2  ;;  %p32_p4 = scmp.ge.s32.totalorder %s5100_s30, 2 }
   0x9   : > { %s5102_s30 = smov (%p32_p4, %s5100_s30), 0  ;;  %332 = sbr.rel (%p329_p3) target bundleno = 422 (0x1a6), region = 44 }
   0xe   : > { %v3611_v0 = vld [vmem:[%s4971_s3 + $0x138] sm:$0xff]   ;;  %s3800_s10 = sshll.u32 %s3705_s24, 3  ;;  %p405_p5 = scmp.lt.s32.totalorder %s3709_s25, 1  ;;  %v3614_v3 = vld [vmem:[%s4971_s3 + $0x130] sm:$0xff]   ;;  %v3617_v6 = vld [vmem:[%s4971_s3 + $0x128] sm:$0xff]   ;;  %v583_v7 = vlaneseq  ;;  %vm4978_vm6 = vmmov 1  }
   0xf   : > { %v3612_v1 = vld [vmem:[%s4971_s3 + $0x178] sm:$0xff]   ;;  %3234 = vmatprep.subr.bf16.mxu0 %v3611_v0  ;;  %p407_p6 = scmp.lt.s32.totalorder %s3800_s10, 15  ;;  %v3615_v4 = vld [vmem:[%s4971_s3 + $0x170] sm:$0xff]   ;;  %v3618_v8 = vld [vmem:[%s4971_s3 + $0x168] sm:$0xff]   ;;  %s2684_s13 = sadd.s32 4294967295, %s3800_s10 }
  0x10   : > { %v3613_v2 = vld [vmem:[%s4971_s3 + $0xf8] sm:$0xff]   ;;  %3474 = vmatprep.subr.bf16.mxu1 %v3612_v1  ;;  %s5104_s25 = smov (!%p405_p5, %s3709_s25), 1  ;;  %v3616_v5 = vld [vmem:[%s4971_s3 + $0xf0] sm:$0xff]   ;;  %v3619_v9 = vld [vmem:[%s4971_s3 + $0xe8] sm:$0xff]   ;;  %v3842_v12 = vshrl.u32 %v583_v7, 7  ;;  %p417_p7 = scmp.gt.s32.totalorder %s2684_s13, 0 }
  0x11   : > { %3235 = vmatpush3.bf16.msra.mxu0 %v3613_v2  ;;  %3475 = vmatpush3.bf16.msra.mxu1 %v3612_v1  ;;  %s408_s19 = scalar_select %p407_p6, %s3800_s10, 15  ;;  %v3620_v10 = vld [vmem:[%s4971_s3 + $0x120] sm:$0xff]   ;;  %v3623_v14 = vld [vmem:[%s4971_s3 + $0x118] sm:$0xff]   ;;  %v3626_v18 = vld [vmem:[%s4971_s3 + $0x110] sm:$0xff]  }
  0x12   : > { %3236 = vmatprep.subr.bf16.mxu0 %v3614_v3  ;;  %3476 = vmatprep.subr.bf16.mxu1 %v3615_v4  ;;  %s3825_s8 = sshll.u32 %s5104_s25, 5  ;;  %v3621_v11 = vld [vmem:[%s4971_s3 + $0x160] sm:$0xff]   ;;  %v3624_v15 = vld [vmem:[%s4971_s3 + $0x158] sm:$0xff]   ;;  %v587_v16 = vadd.s32 24, %v3842_v12  ;;  %p2685_p8 = scmp.lt.s32.totalorder %s2684_s13, 15  ;;  %v3627_v19 = vld [vmem:[%s4971_s3 + $0x150] sm:$0xff]  }
  0x13   : > { %s2680_s12 = sshll.u32 %s408_s19, 1  ;;  %v3622_v13 = vld [vmem:[%s4971_s3 + $0xe0] sm:$0xff]   ;;  %v3625_v17 = vld [vmem:[%s4971_s3 + $0xd8] sm:$0xff]   ;;  %s5106_s13 = smov (!%p417_p7, %s2684_s13), 0  ;;  %v3628_v20 = vld [vmem:[%s4971_s3 + $0xd0] sm:$0xff]   ;;  %v586_v21 = vadd.s32 16, %v3842_v12 }
  0x14   : > { %s3840_s20 = sadd.s32 %s3825_s8, %s2680_s12  ;;  %v3629_v22 = vld [vmem:[%s4971_s3 + $0x108] sm:$0xff]   ;;  %s5108_s13 = smov (!%p2685_p8, %s5106_s13), 15  ;;  %v757_v24 = vand.u32 15, %v587_v16  ;;  %v3632_v27 = vld [vmem:[%s4971_s3 + $0x100] sm:$0xff]   ;;  %vm4976_vm1 = vcmp.lt.s32.totalorder %v3842_v12, 1  ;;  %vm4980_vm2 = vcmp.lt.s32.totalorder %v3842_v12, 7 }
  0x15   : > { %3237 = vmatpush3.bf16.msra.mxu0 %v3616_v5  ;;  %3477 = vmatpush3.bf16.msra.mxu1 %v3615_v4  ;;  %s2682_s12 = sshll.u32 %s3840_s20, 2  ;;  %v3630_v23 = vld [vmem:[%s4971_s3 + $0x148] sm:$0xff]   ;;  %s2690_s18 = sshll.u32 %s5108_s13, 1  ;;  %v750_v26 = vand.u32 15, %v586_v21  ;;  %v3633_v28 = vld [vmem:[%s4971_s3 + $0x140] sm:$0xff]   ;;  %v589_v37 = vadd.s32 40, %v3842_v12 }
  0x16   : > { %3238 = vmatprep.subr.bf16.mxu0 %v3617_v6  ;;  %3478 = vmatprep.subr.bf16.mxu1 %v3618_v8  ;;  %s3880_s17 = scalar_lea.vmem %s4968_s0, %s2682_s12  ;;  %p624_p9 = scmp.eq.s32.totalorder %s3705_s24, 0  ;;  %v3631_v25 = vld [vmem:[%s4971_s3 + $0xc8] sm:$0xff]   ;;  %v3897_v30 = vld [vmem:[%s4972_s4] ss:$0 sm:$0xff]  ;;  %vm3899_vm0 = vcmp.ne.s32.totalorder %v757_v24, 15  ;;  %v3926_v43 = vadd.s32 56, %v3842_v12 }
  0x17   : > { %s425_s22 = sadd.s32 %s2690_s18, %s3825_s8  ;;  %v3125_v29 = vld [vmem:[%s3880_s17] sm:$0xff]   ;;  %v3200_v34 = vld [vmem:[%s3880_s17 + $0x8] sm:$0xff]   ;;  %vm3913_vm3 = vcmp.ne.s32.totalorder %v750_v26, 0  ;;  %v3201_v42 = vld [vmem:[%s3880_s17 + $0x10] sm:$0xff]   ;;  %s3103_s15 = sadd.s32 8, %s3800_s10  ;;  %v771_v57 = vand.u32 15, %v589_v37 }
  0x18   : > { %s2692_s11 = sshll.u32 %s425_s22, 2  ;;  %v3126_v32 = vunpack.c.l.bf16 %v3125_v29  ;;  %v3127_v33 = vunpack.c.h.bf16 %v3125_v29  ;;  %v3921_v38 = vld [vmem:[%s4973_s5] ss:$0 sm:$0xff]  ;;  %v3130_v39 = vunpack.c.l.bf16 %v3200_v34  ;;  %v3131_v40 = vunpack.c.h.bf16 %v3200_v34  ;;  %v3635_v53 = vld [vmem:[%s4971_s3 + $0x78] sm:$0xff]   ;;  %p3974_p10 = scmp.lt.s32.totalorder %s3103_s15, 15  ;;  %vm3992_vm7 = vmpackc.low %vm3899_vm0, %vm4978_vm6 }
  0x19   : > { %3239 = vmatpush3.bf16.msra.mxu0 %v3619_v9  ;;  %3479 = vmatpush3.bf16.msra.mxu1 %v3618_v8  ;;  %s427_s21 = scalar_lea.vmem %s4969_s1, %s2692_s11  ;;  %v3634_v44 = vld [vmem:[%s4971_s3 + $0xc0] sm:$0xff]   ;;  %v3134_v48 = vunpack.c.l.bf16 %v3201_v42  ;;  %v3950_v58 = vld [vmem:[%s4971_s3 + $0xb8] sm:$0xff]   ;;  %v3135_v62 = vunpack.c.h.bf16 %v3201_v42  ;;  %vm3962_vm5 = vcmp.ne.s32.totalorder %v771_v57, 15  ;;  %vm4011_vm8 = vmpackc.low %vm4978_vm6, %vm3913_vm3  ;;  %p688_p11 = scmp.eq.s32.totalorder %s3705_s24, 1 }
  0x1a   : > { %3240 = vmatprep.subr.bf16.mxu0 %v3620_v10  ;;  %3480 = vmatprep.subr.bf16.mxu1 %v3621_v11  ;;  %v3909_v35 = vld [vmem:[%s427_s21] sm:$0xff]   ;;  %s625_s22 = scalar_select %p624_p9, 1, 0  ;;  %v518_v45 = vmul.f32 %v3126_v32, %v3897_v30  ;;  %v519_v46 = vmul.f32 %v3127_v33, %v3897_v30  ;;  %v520_v49 = vmul.f32 %v3130_v39, %v3897_v30  ;;  %v3637_v26 = vld [vmem:[%s4971_s3 + $0x38] sm:$0xff]   ;;  %vm4041_vm9 = vmpackc.low %vm3962_vm5, %vm4978_vm6  ;;  %v785_v39 = vand.u32 15, %v3926_v43 }
  0x1b   : > { %v3123_v41 = vunpack.c.h.bf16 %v3909_v35  ;;  %v521_v52 = vmul.f32 %v3131_v40, %v3897_v30  ;;  %v522_v56 = vmul.f32 %v3134_v48, %v3897_v30  ;;  %v523_v6 = vmul.f32 %v3135_v62, %v3897_v30  ;;  %s5110_s15 = smov (!%p3974_p10, %s3103_s15), 15  ;;  %v3203_v40 = vld [vmem:[%s3880_s17 + $0x20] sm:$0xff]   ;;  %v3638_v42 = vld [vmem:[%s4971_s3 + $0x70] sm:$0xff]   ;;  %v4106_v62 = vld [vmem:[%s3880_s17 + $0x28] sm:$0xff]   ;;  %s4903_s13 = scalar_lea.vmem %s4974_s6, %s2682_s12 }
  0x1c   : > { %v626_v47 = vstv %s625_s22  ;;  %v545_v54 = vadd.f32 %v3921_v38, %v518_v45  ;;  %v546_v55 = vadd.f32 %v3921_v38, %v519_v46  ;;  %v547_v59 = vadd.f32 %v3921_v38, %v520_v49  ;;  %v3641_v43 = vld [vmem:[%s4971_s3 + $0xb0] sm:$0xff]   ;;  %s5112_s15 = smov (!%p3974_p10, %s5110_s15), 15  ;;  %p462_p12 = scmp.lt.s32.totalorder %s3705_s24, 1 }
  0x1d   : > { %3241 = vmatpush3.bf16.msra.mxu0 %v3622_v13  ;;  %3481 = vmatpush3.bf16.msra.mxu1 %v3621_v11  ;;  %v517_v50 = vmul.f32 %v3123_v41, %v3897_v30  ;;  %vm3936_vm4 = vcmp.eq.s32.totalorder %v626_v47, 1  ;;  %v548_v61 = vadd.f32 %v3921_v38, %v521_v52  ;;  %v549_v1 = vadd.f32 %v3921_v38, %v522_v56  ;;  %v3202_v11 = vld [vmem:[%s3880_s17 + $0x18] sm:$0xff]   ;;  %v3639_v52 = vld [vmem:[%s4971_s3 + $0x30] sm:$0xff]   ;;  %s4133_s23 = sshll.u32 %s5112_s15, 1  ;;  %s2704_s20 = sshll.u32 %s5104_s25, 1 }
  0x1e   : > { %3242 = vmatprep.subr.bf16.mxu0 %v3623_v14  ;;  %3482 = vmatprep.subr.bf16.mxu1 %v3624_v15  ;;  %v3957_v63 = vmax.f32 %v545_v54, 0.0  ;;  %v3959_v0 = vmax.f32 %v546_v55, 0.0  ;;  %v3966_v3 = vmax.f32 %v547_v59, 0.0  ;;  %v550_v33 = vadd.f32 %v3921_v38, %v523_v6  ;;  %v3640_v6 = vld [vmem:[%s4971_s3 + $0x68] sm:$0xff]   ;;  %s442_s16 = sadd.s32 %s4133_s23, %s3825_s8  ;;  %s5114_s24 = smov (!%p462_p12, %s3705_s24), 1 }
  0x1f   : > { %v3954_v60 = vadd.f32 %v3921_v38, %v517_v50  ;;  %v3969_v5 = vmax.f32 %v548_v61, 0.0  ;;  %v588_v45 = vadd.s32 32, %v3842_v12  ;;  %vm4078_vm10 = vcmp.ne.s32.totalorder %v785_v39, 15  ;;  %s4218_s8 = sshll.u32 %s442_s16, 2  ;;  %s465_s12 = sadd.s32 %s2704_s20, %s5114_s24 }
  0x20   : > { %v994_v7 = vrot.slane %v3957_v63, 7  ;;  %v995_v8 = vrot.slane %v3959_v0, 7  ;;  %v3982_v9 = vpack.c.bf16 %v3959_v0, %v3957_v63  ;;  %v4977_v10 = vrot.slane %v3957_v63, 1  ;;  %vm4140_vm13 = vmpackc.low %vm4078_vm10, %vm4978_vm6  ;;  %s444_s21 = scalar_lea.vmem %s4970_s2, %s4218_s8  ;;  %s2705_s16 = sshll.u32 %s465_s12, 1 }
  0x21   : > { %3243 = vmatpush3.bf16.msra.mxu0 %v3625_v17  ;;  %3483 = vmatpush3.bf16.msra.mxu1 %v3624_v15  ;;  %v564_v4 = vmax.f32 %v3954_v60, 0.0  ;;  %v1076_v13 = vrot.slane %v3959_v0, 1  ;;  %v1077_v14 = vrot.slane %v3966_v3, 1  ;;  %v4002_v17 = vmax.f32 %v549_v1, 0.0  ;;  %v3646_v0 = vld [vmem:[%s4971_s3 + $0xa8] sm:$0xff]  }
  0x22   : > { %3244 = vmatprep.subr.bf16.mxu0 %v3626_v18  ;;  %3484 = vmatprep.subr.bf16.mxu1 %v3627_v19  ;;  %v1078_v21 = vrot.slane %v3969_v5, 1  ;;  %v996_v46 = vrot.slane %v3966_v3, 7  ;;  %v997_v49 = vrot.slane %v3969_v5, 7  ;;  %v3139_v50 = vunpack.c.h.bf16 %v3202_v11  ;;  %v3665_v15 = vld [vmem:[%s4971_s3 + $0x1e8] sm:$0xff]  }
  0x23   : > { %v4000_v16 = vsel %vm3936_vm4, 0.0, %v564_v4  ;;  %1437 = vmatprep.mubr.bf16.mxu0 %v3982_v9  ;;  %v1110_v24 = vsel %vm4980_vm2, %v4977_v10, %v1076_v13  ;;  %v764_v54 = vand.u32 15, %v588_v45  ;;  %v3142_v56 = vunpack.c.l.bf16 %v3203_v40  ;;  %v4164_v45 = vld [vmem:[%s3880_s17 + $0x30] sm:$0xff]  }
  0x24   : > { %v993_v18 = vrot.slane %v4000_v16, 7  ;;  %v1108_v31 = vsel %vm4980_vm2, %v1077_v14, %v1078_v21  ;;  %v1028_v55 = vsel %vm4976_vm1, %v995_v8, %v996_v46  ;;  %v525_v59 = vmul.f32 %v3139_v50, %v3897_v30 }
  0x25   : > { %3245 = vmatpush3.bf16.msra.mxu0 %v3628_v20  ;;  %3485 = vmatpush3.bf16.msra.mxu1 %v3627_v19  ;;  %v1029_v19 = vsel %vm4976_vm1, %v994_v7, %v995_v8  ;;  %v593_v61 = vadd.s32 72, %v3842_v12  ;;  %vm3219_vm11 = vcmp.ne.s32.totalorder %v764_v54, 0  ;;  %v998_v50 = vrot.slane %v4002_v17, 7  ;;  %v3673_v20 = vld [vmem:[%s4971_s3 + $0x218] sm:$0xff]  }
  0x26   : > { %3246 = vmatprep.subr.bf16.mxu0 %v3629_v22  ;;  %3486 = vmatprep.subr.bf16.mxu1 %v3630_v23  ;;  %v4018_v22 = vpack.c.bf16 %v3969_v5, %v3966_v3  ;;  %v1030_v29 = vsel %vm4976_vm1, %v993_v18, %v994_v7  ;;  %v526_v3 = vmul.f32 %v3142_v56, %v3897_v30  ;;  %vm4126_vm12 = vmpackc.low %vm4978_vm6, %vm3219_vm11 }
  0x27   : > { %v4052_v34 = vpack.c.bf16 %v1029_v19, %v1030_v29  ;;  %v552_v8 = vadd.f32 %v3921_v38, %v525_v59  ;;  %v3647_v29 = vld [vmem:[%s4971_s3 + $0x18] sm:$0xff]   ;;  %v3649_v59 = vld [vmem:[%s4971_s3 + $0x10] sm:$0xff]  }
  0x28   : > { %v553_v19 = vadd.f32 %v3921_v38, %v526_v3  ;;  %v4216_v3 = vld [vmem:[%s3880_s17 + $0x38] sm:$0xff]   ;;  %s4236_s17 = scalar_select %p688_p11, 1, 0 }
  0x29   : > { %3247 = vmatpush3.bf16.msra.mxu0 %v3631_v25  ;;  %3487 = vmatpush3.bf16.msra.mxu1 %v3630_v23  ;;  %v1109_v23 = vsel %vm4980_vm2, %v1076_v13, %v1077_v14  ;;  %v1079_v25 = vrot.slane %v4002_v17, 1 }
  0x2a   : > { %3248 = vmatprep.subr.bf16.mxu0 %v3632_v27  ;;  %3488 = vmatprep.subr.bf16.mxu1 %v3633_v28  ;;  %v3138_v27 = vunpack.c.l.bf16 %v3202_v11  ;;  %v799_v11 = vand.u32 15, %v593_v61  ;;  %v4159_v39 = vmax.f32 %v553_v19, 0.0  ;;  %v3150_v19 = vunpack.c.l.bf16 %v4164_v45 }
  0x2b   : > { %v1107_v36 = vsel %vm4980_vm2, %v1078_v21, %v1079_v25  ;;  %v3143_v21 = vunpack.c.h.bf16 %v3203_v40 }
  0x2c   : > { %v524_v37 = vmul.f32 %v3138_v27, %v3897_v30  ;;  %v4062_v41 = vpack.c.bf16 %v1107_v36, %v1108_v31  ;;  %v4144_v27 = vmax.f32 %v552_v8, 0.0  ;;  %vm4146_vm14 = vcmp.ne.s32.totalorder %v799_v11, 15  ;;  %v3642_v31 = vld [vmem:[%s4971_s3 + $0x28] sm:$0xff]  }
  0x2d   : > { %3249 = vmatpush3.bf16.msra.mxu0 %v3634_v44  ;;  %3489 = vmatpush3.bf16.msra.mxu1 %v3633_v28  ;;  %v4030_v28 = vpack.c.bf16 %v1109_v23, %v1110_v24  ;;  %v4067_v44 = vmax.f32 %v550_v33, 0.0  ;;  %v3146_v23 = vunpack.c.l.bf16 %v4106_v62  ;;  %v595_v24 = vadd.s32 88, %v3842_v12  ;;  %v3643_v33 = vld [vmem:[%s4971_s3 + $0x60] sm:$0xff]   ;;  %vm4203_vm3 = vmpackc.low %vm4146_vm14, %vm4978_vm6 }
  0x2e   : > { %3314 = vmatprep.subr.bf16.mxu1 %v3635_v53  ;;  %3506 = vmatprep.subr.bf16.mxu0 %v3950_v58  ;;  %v551_v47 = vadd.f32 %v3921_v38, %v524_v37  ;;  %v590_v36 = vadd.s32 48, %v3842_v12  ;;  %v527_v40 = vmul.f32 %v3143_v21, %v3897_v30  ;;  %v3147_v11 = vunpack.c.h.bf16 %v4106_v62  ;;  %v3645_v21 = vld [vmem:[%s4971_s3 + $0x58] sm:$0xff]  }
  0x2f   : > { %3490 = vmatprep.mubr.msk.bf16.mxu1 %vm3992_vm7, %v4030_v28  ;;  %v1080_v53 = vrot.slane %v4067_v44, 1  ;;  %v4123_v13 = vpack.c.bf16 %v4067_v44, %v4002_v17  ;;  %v999_v17 = vrot.slane %v4067_v44, 7  ;;  %v597_v62 = vadd.s32 104, %v3842_v12 }
  0x30   : > { %2783 = vmatmul.mubr.msk.bf16.vlgmr.msra.gmra.mxu0 %vm4011_vm8, %v4052_v34  ;;  %3491 = vmatmul.mubr.msk.bf16.vlgmr.msra.gmra.mxu1 %vm4041_vm9, %v4062_v41  ;;  %v4097_v57 = vmax.f32 %v551_v47, 0.0  ;;  %v813_v47 = vand.u32 15, %v595_v24  ;;  %v778_v48 = vand.u32 15, %v590_v36  ;;  %v554_v54 = vadd.f32 %v3921_v38, %v527_v40 }
  0x31   : > { %3507 = vmatpush3.bf16.msra.mxu0 %v3950_v58  ;;  %3315 = vmatpush3.bf16.msra.mxu1 %v3637_v26  ;;  %v1027_v58 = vsel %vm4976_vm1, %v996_v46, %v997_v49  ;;  %v1106_v1 = vsel %vm4980_vm2, %v1079_v25, %v1080_v53  ;;  %v3651_v46 = vld [vmem:[%s4971_s3 + $0xa0] sm:$0xff]   ;;  %v530_v36 = vmul.f32 %v3150_v19, %v3897_v30  ;;  %v3151_v40 = vunpack.c.h.bf16 %v4164_v45  ;;  %v3656_v45 = vld [vmem:[%s4971_s3 + $0x90] sm:$0xff]  }
  0x32   : > { %1445 = vmatprep.mubr.bf16.mxu0 %v4018_v22  ;;  %3316 = vmatprep.subr.bf16.mxu1 %v3638_v42  ;;  %v4113_v2 = vpack.c.bf16 %v1027_v58, %v1028_v55  ;;  %v1081_v7 = vrot.slane %v4097_v57, 1  ;;  %v528_v42 = vmul.f32 %v3146_v23, %v3897_v30  ;;  %vm3230_vm15 = vcmp.ne.s32.totalorder %v813_v47, 15 }
  0x33   : > { %3508 = vmatprep.subr.bf16.mxu0 %v3641_v43  ;;  %v1026_v58 = vsel %vm4976_vm1, %v997_v49, %v998_v50  ;;  %vm4194_vm0 = vcmp.ne.s32.totalorder %v778_v48, 0  ;;  %v4207_v5 = vmax.f32 %v554_v54, 0.0  ;;  %vm4223_vm5 = vmpackc.low %vm3230_vm15, %vm4978_vm6  ;;  %v827_v48 = vand.u32 15, %v597_v62  ;;  %v3655_v54 = vld [vmem:[%s4971_s3 + $0x98] sm:$0xff]  }
  0x34   : > { %v1105_v25 = vsel %vm4980_vm2, %v1080_v53, %v1081_v7  ;;  %v3644_v53 = vld [vmem:[%s4971_s3 + $0x20] sm:$0xff]   ;;  %v555_v55 = vadd.f32 %v3921_v38, %v528_v42  ;;  %vm4243_vm10 = vmpackc.low %vm4978_vm6, %vm4194_vm0  ;;  %v3154_v42 = vunpack.c.l.bf16 %v4216_v3  ;;  %v1000_v62 = vrot.slane %v4097_v57, 7 }
  0x35   : > { %3509 = vmatpush3.bf16.msra.mxu0 %v3641_v43  ;;  %3317 = vmatpush3.bf16.msra.mxu1 %v3639_v52  ;;  %v4157_v37 = vpack.c.bf16 %v1105_v25, %v1106_v1  ;;  %v1082_v43 = vrot.slane %v4144_v27, 1  ;;  %v1083_v52 = vrot.slane %v4159_v39, 1  ;;  %v1084_v23 = vrot.slane %v4207_v5, 1 }
  0x36   : > { %3510 = vmatprep.subr.bf16.mxu0 %v3646_v0  ;;  %3318 = vmatprep.subr.bf16.mxu1 %v3640_v6  ;;  %v4209_v49 = vmax.f32 %v555_v55, 0.0  ;;  %vm4288_vm11 = vcmp.ne.s32.totalorder %v827_v48, 15  ;;  %v5028_v48 = vmov 0 }
  0x37   : > { %3494 = vmatprep.mubr.msk.bf16.mxu1 %vm4140_vm13, %v4157_v37  ;;  %v1104_v56 = vsel %vm4980_vm2, %v1081_v7, %v1082_v43  ;;  %v1103_v61 = vsel %vm4980_vm2, %v1082_v43, %v1083_v52  ;;  %v5020_v7 = vmov 0  ;;  %v1102_v47 = vsel %vm4980_vm2, %v1083_v52, %v1084_v23  ;;  %vm4321_vm15 = vmpackc.low %vm4288_vm11, %vm4978_vm6 }
  0x38   : > { %2787 = vmatmul.mubr.msk.bf16.gmra.mxu0 %vm4126_vm12, %v4113_v2  ;;  %v4220_v6 = vpack.c.bf16 %v1103_v61, %v1104_v56  ;;  %v5021_v7 = vsel %vm4223_vm5, 4294967295, %v5020_v7  ;;  %v1085_v24 = vrot.slane %v4209_v49, 1  ;;  %v557_v52 = vadd.f32 %v3921_v38, %v530_v36 }
  0x39   : > { %1453 = vmatprep.mubr.bf16.mxu0 %v4123_v13  ;;  %3319 = vmatpush3.bf16.msra.mxu1 %v3642_v31  ;;  %v4253_v31 = vpack.c.bf16 %v4144_v27, %v4097_v57  ;;  %v592_v56 = vadd.s32 64, %v3842_v12  ;;  %v531_v61 = vmul.f32 %v3151_v40, %v3897_v30  ;;  %v5029_v48 = vsel %vm4321_vm15, 4294967295, %v5028_v48  ;;  %v3654_v40 = vld [vmem:[%s4971_s3] sm:$0xff]  }
  0x3a   : > { %3511 = vmatpush3.bf16.msra.mxu0 %v3646_v0  ;;  %3320 = vmatprep.subr.bf16.mxu1 %v3643_v33  ;;  %v1025_v0 = vsel %vm4976_vm1, %v998_v50, %v999_v17  ;;  %v529_v33 = vmul.f32 %v3147_v11, %v3897_v30  ;;  %v1101_v43 = vsel %vm4980_vm2, %v1084_v23, %v1085_v24  ;;  %v599_v50 = vadd.s32 120, %v3842_v12 }
  0x3b   : > { %3512 = vmatprep.subr.bf16.mxu0 %v3651_v46  ;;  %v4227_v8 = vpack.c.bf16 %v1025_v0, %v1026_v58  ;;  %3495 = vmatmul.mubr.msk.bf16.gmra.mxu1 %vm4203_vm3, %v4220_v6  ;;  %v4273_v55 = vpack.c.bf16 %v1101_v43, %v1102_v47  ;;  %v532_v0 = vmul.f32 %v3154_v42, %v3897_v30  ;;  %v792_v23 = vand.u32 15, %v592_v56  ;;  %v3157_v43 = vld [vmem:[%s444_s21] sm:$0xff]   ;;  %v3657_v47 = vld [vmem:[%s4971_s3 + $0x88] sm:$0xff]  }
  0x3c   : > { %v841_v11 = vand.u32 15, %v599_v50  ;;  %v1001_v42 = vrot.slane %v4144_v27, 7  ;;  %v1024_v50 = vsel %vm4976_vm1, %v999_v17, %v1000_v62  ;;  %v3155_v17 = vunpack.c.h.bf16 %v4216_v3 }
  0x3d   : > { %3321 = vmatpush3.bf16.msra.mxu1 %v3644_v53  ;;  %v3648_v53 = vld [vmem:[%s4971_s3 + $0x50] sm:$0xff]   ;;  %3498 = vmatprep.mubr.msk.bf16.mxu1 %vm4223_vm5, %v4273_v55  ;;  %v559_v36 = vadd.f32 %v3921_v38, %v532_v0  ;;  %vm3221_vm0 = vcmp.ne.s32.totalorder %v792_v23, 0  ;;  %v3658_v23 = vld [vmem:[%s4971_s3 + $0x80] sm:$0xff]  }
  0x3e   : > { %3513 = vmatpush3.bf16.msra.mxu0 %v3651_v46  ;;  %v556_v46 = vadd.f32 %v3921_v38, %v529_v33  ;;  %3322 = vmatprep.subr.bf16.mxu1 %v3645_v21  ;;  %v4303_v21 = vmax.f32 %v557_v52, 0.0  ;;  %v558_v33 = vadd.f32 %v3921_v38, %v531_v61  ;;  %vm4308_vm14 = vcmp.ne.s32.totalorder %v841_v11, 15  ;;  %vm4341_vm11 = vmpackc.low %vm4978_vm6, %vm3221_vm0 }
  0x3f   : > { %3514 = vmatprep.subr.bf16.mxu0 %v3655_v54  ;;  %v4334_v52 = vmax.f32 %v559_v36, 0.0  ;;  %v1023_v56 = vsel %vm4976_vm1, %v1000_v62, %v1001_v42  ;;  %v3158_v11 = vunpack.c.l.bf16 %v3157_v43  ;;  %v3159_v36 = vunpack.c.h.bf16 %v3157_v43  ;;  %vm4382_vm0 = vmpackc.low %vm4308_vm14, %vm4978_vm6 }
  0x40   : > { %2791 = vmatmul.mubr.msk.bf16.gmra.mxu0 %vm4243_vm10, %v4227_v8  ;;  %v4301_v19 = vmax.f32 %v556_v46, 0.0  ;;  %v4332_v46 = vmax.f32 %v558_v33, 0.0  ;;  %v4353_v0 = vpack.c.bf16 %v1023_v56, %v1024_v50  ;;  %v690_v50 = vstv %s4236_s17  ;;  %s467_s17 = scalar_lea.vmem %s4975_s7, %s2705_s16 }
  0x41   : > { %1461 = vmatprep.mubr.bf16.mxu0 %v4253_v31  ;;  %3323 = vmatpush3.bf16.msra.mxu1 %v3647_v29  ;;  %v1087_v29 = vrot.slane %v4303_v21, 1  ;;  %v1089_v33 = vrot.slane %v4334_v52, 1  ;;  %vm4387_vm1 = vcmp.eq.s32.totalorder %v690_v50, 1  ;;  %v3122_v50 = vunpack.c.l.bf16 %v3909_v35 }
  0x42   : > { %3515 = vmatpush3.bf16.msra.mxu0 %v3655_v54  ;;  %v1086_v57 = vrot.slane %v4301_v19, 1  ;;  %3324 = vmatprep.subr.bf16.mxu1 %v3648_v53  ;;  %v3650_v54 = vld [vmem:[%s4971_s3 + $0x48] sm:$0xff]   ;;  %v1088_v62 = vrot.slane %v4332_v46, 1  ;;  %v1002_v35 = vrot.slane %v4159_v39, 7  ;;  %vm5038_vm6 = vcmp.lt.s32.totalorder %v3842_v12, 1 }
  0x43   : > { %3516 = vmatprep.subr.bf16.mxu0 %v3656_v45  ;;  %v3652_v53 = vld [vmem:[%s4971_s3 + $0x8] sm:$0xff]  }
  0x44   : > { %v1099_v58 = vsel %vm4980_vm2, %v1086_v57, %v1087_v29  ;;  %v1100_v61 = vsel %vm4980_vm2, %v1085_v24, %v1086_v57  ;;  %v533_v24 = vmul.f32 %v3155_v17, %v3897_v30  ;;  %v601_v57 = vadd.s32 136, %v3842_v12 }
  0x45   : > { %v4358_v3 = vpack.c.bf16 %v1099_v58, %v1100_v61  ;;  %3325 = vmatpush3.bf16.msra.mxu1 %v3649_v59  ;;  %v3653_v59 = vld [vmem:[%s4971_s3 + $0x40] sm:$0xff]   ;;  %v1097_v43 = vsel %vm4980_vm2, %v1088_v62, %v1089_v33  ;;  %v1098_v56 = vsel %vm4980_vm2, %v1087_v29, %v1088_v62  ;;  %v5032_v17 = vmov 0  ;;  %vm2868_vm2 = vmneg %vm3936_vm4 }
  0x46   : > { %3517 = vmatpush3.bf16.msra.mxu0 %v3656_v45  ;;  %v534_v45 = vmul.f32 %v3158_v11, %v3897_v30  ;;  %3326 = vmatprep.subr.bf16.mxu1 %v3650_v54  ;;  %v5033_v17 = vsel %vm4382_vm0, 4294967295, %v5032_v17  ;;  %v535_v54 = vmul.f32 %v3159_v36, %v3897_v30  ;;  %v5034_v58 = vmov 0 }
  0x47   : > { %3518 = vmatprep.subr.bf16.mxu0 %v3657_v47  ;;  %3499 = vmatmul.mubr.msk.bf16.gmra.mxu1 %vm4321_vm15, %v4358_v3  ;;  %v5035_v58 = vsel %vm4387_vm1, 4294967295, %v5034_v58  ;;  %v4391_v61 = vpack.c.bf16 %v1097_v43, %v1098_v56  ;;  %v560_v11 = vadd.f32 %v3921_v38, %v533_v24  ;;  %v855_v29 = vand.u32 15, %v601_v57  ;;  %v4426_v43 = vld [vmem:[%s4971_s3 + $0x238] sm:$0xff]  }
  0x48   : > { %2795 = vmatmul.mubr.msk.bf16.gmra.mxu0 %vm4341_vm11, %v4353_v0  ;;  %v4395_v10 = vadd.f32 %v3921_v38, %v534_v45  ;;  %v4401_v62 = vadd.f32 %v3921_v38, %v535_v54  ;;  %v4405_v36 = vpack.c.bf16 %v4207_v5, %v4159_v39  ;;  %v594_v24 = vadd.s32 80, %v3842_v12  ;;  %v3660_v45 = vld [vmem:[%s4971_s3 + $0x1f8] sm:$0xff]  }
  0x49   : > { %3327 = vmatpush3.bf16.msra.mxu1 %v3652_v53  ;;  %3502 = vmatprep.mubr.msk.bf16.mxu1 %vm4382_vm0, %v4391_v61  ;;  %vm4418_vm14 = vcmp.ne.s32.totalorder %v855_v29, 15  ;;  %v516_v54 = vmul.f32 %v3122_v50, %v3897_v30  ;;  %vm5039_vm0 = vmmov %vm5038_vm6  ;;  %vm5040_vm15 = vcmp.lt.s32.totalorder %v3842_v12, 7  ;;  %v4476_v57 = vpack.c.bf16 %v4301_v19, %v4209_v49 }
  0x4a   : > { %3519 = vmatpush3.bf16.msra.mxu0 %v3657_v47  ;;  %v4415_v47 = vmax.f32 %v560_v11, 0.0  ;;  %v581_v53 = vmax.f32 %v4395_v10, 0.0  ;;  %3328 = vmatprep.subr.bf16.mxu1 %v3653_v59  ;;  %v582_v56 = vmax.f32 %v4401_v62, 0.0  ;;  %v806_v11 = vand.u32 15, %v594_v24 }
  0x4b   : > { %3520 = vmatprep.subr.bf16.mxu0 %v3658_v23  ;;  %1469 = vmatprep.mubr.bf16.mxu0 %v4405_v36  ;;  %v1003_v10 = vrot.slane %v4207_v5, 7  ;;  %v1022_v59 = vsel %vm5038_vm6, %v1001_v42, %v1002_v35  ;;  %v543_v5 = vadd.f32 %v3921_v38, %v516_v54  ;;  %vm5041_vm6 = vmmov 1  }
  0x4c   : > { %v4434_v29 = vsel %vm4387_vm1, 0.0, %v581_v53  ;;  %v1090_v39 = vrot.slane %v4415_v47, 1  ;;  %v4443_v62 = vsel %vm4387_vm1, 0.0, %v582_v56  ;;  %vm4456_vm1 = vmpackc.low %vm4418_vm14, %vm5041_vm6  ;;  %v5042_v42 = vmov 0 }
  0x4d   : > { %v1091_v30 = vrot.slane %v4434_v29, 1  ;;  %3329 = vmatpush3.bf16.msra.mxu1 %v3654_v40  ;;  %v1021_v50 = vsel %vm5039_vm0, %v1002_v35, %v1003_v10  ;;  %v5043_v42 = vsel %vm4456_vm1, 4294967295, %v5042_v42  ;;  %vm3222_vm5 = vcmp.ne.s32.totalorder %v806_v11, 0  ;;  %vm2870_vm14 = vmpackc.low %vm2868_vm2, %vm2868_vm2 }
  0x4e   : > { %3521 = vmatpush3.bf16.msra.mxu0 %v3658_v23  ;;  %v1096_v27 = vsel %vm5040_vm15, %v1089_v33, %v1090_v39  ;;  %v4460_v23 = vpack.c.bf16 %v1021_v50, %v1022_v59  ;;  %v736_v38 = vand.u32 15, %v3842_v12  ;;  %3538 = vmatprep.subr.bf16.mxu1 %v4426_v43  ;;  %v1011_v40 = vrot.slane %v4443_v62, 7  ;;  %vm4470_vm0 = vmpackc.low %vm5041_vm6, %vm3222_vm5 }
  0x4f   : > { %3394 = vmatprep.subr.bf16.mxu0 %v3660_v45  ;;  %v1095_v33 = vsel %vm5040_vm15, %v1090_v39, %v1091_v30  ;;  %v563_v24 = vmax.f32 %v543_v5, 0.0  ;;  %v5044_v45 = vmov 0  ;;  %v596_v54 = vadd.s32 96, %v3842_v12 }
  0x50   : > { %v5045_v45 = vsel %vm4470_vm0, 4294967295, %v5044_v45  ;;  %v4478_v35 = vpack.c.bf16 %v1095_v33, %v1096_v27  ;;  %2799 = vmatmul.mubr.msk.bf16.gmra.mxu0 %vm4470_vm0, %v4460_v23  ;;  %v1004_v11 = vrot.slane %v4209_v49, 7  ;;  %v1005_v39 = vrot.slane %v4301_v19, 7 }
  0x51   : > { %v4488_v59 = vsel %vm3936_vm4, 0.0, %v563_v24  ;;  %v2871_v5 = vpack.c.bf16 %v564_v4, %v563_v24  ;;  %1477 = vmatprep.mubr.bf16.mxu0 %v4476_v57  ;;  %v820_v27 = vand.u32 15, %v596_v54  ;;  %vm5046_vm2 = vcmp.lt.s32.totalorder %v3842_v12, 1 }
  0x52   : > { %3503 = vmatmul.mubr.msk.bf16.gmra.mxu1 %vm4456_vm1, %v4478_v35  ;;  %v992_v50 = vrot.slane %v4488_v59, 7  ;;  %v1019_v49 = vsel %vm5046_vm2, %v1004_v11, %v1005_v39  ;;  %v598_v19 = vadd.s32 112, %v3842_v12  ;;  %vm3207_vm4 = vcmp.ne.s32.totalorder %v736_v38, 0  ;;  %vm5047_vm5 = vmmov %vm5046_vm2 }
  0x53   : > { %2872 = vmatprep.mubr.msk.bf16.mxu1 %vm2870_vm14, %v2871_v5  ;;  %v1020_v51 = vsel %vm5047_vm5, %v1003_v10, %v1004_v11  ;;  %vm5048_vm15 = vmmov %vm5046_vm2  ;;  %vm3223_vm0 = vcmp.ne.s32.totalorder %v820_v27, 0  ;;  %v4517_v38 = vpack.c.bf16 %v4332_v46, %v4303_v21  ;;  %v1006_v10 = vrot.slane %v4303_v21, 7 }
  0x54   : > { %v1031_v60 = vsel %vm5048_vm15, %v992_v50, %v993_v18  ;;  %vm5049_vm1 = vmmov %vm5046_vm2  ;;  %v4508_v33 = vpack.c.bf16 %v1019_v49, %v1020_v51  ;;  %v1007_v54 = vrot.slane %v4332_v46, 7  ;;  %v834_v11 = vand.u32 15, %v598_v19 }
  0x55   : > { %v1032_v4 = vsel %vm5049_vm1, %v1011_v40, %v992_v50  ;;  %vm4511_vm2 = vmpackc.low %vm5041_vm6, %vm3223_vm0  ;;  %v4522_v5 = vpack.c.bf16 %v582_v56, %v581_v53  ;;  %v3664_v50 = vld [vmem:[%s4971_s3 + $0x230] sm:$0xff]   ;;  %v600_v53 = vadd.s32 128, %v3842_v12  ;;  %v1073_v56 = vrot.slane %v4488_v59, 1 }
  0x56   : > { %v2875_v18 = vpack.c.bf16 %v1031_v60, %v1032_v4  ;;  %vm2874_vm1 = vmpackc.low %vm5041_vm6, %vm3207_vm4  ;;  %vm3224_vm4 = vcmp.ne.s32.totalorder %v834_v11, 0  ;;  %v585_v27 = vadd.s32 8, %v3842_v12  ;;  %v1008_v19 = vrot.slane %v4334_v52, 7 }
  0x57   : > { %vm5052_vm0 = vmmov %vm5047_vm5  ;;  %v1092_v51 = vrot.slane %v4443_v62, 1  ;;  %v1010_v60 = vrot.slane %v4434_v29, 7  ;;  %v1009_v59 = vrot.slane %v4415_v47, 7  ;;  %v1074_v4 = vrot.slane %v4000_v16, 1  ;;  %v3670_v29 = vld [vmem:[%s4971_s3 + $0x220] sm:$0xff]  }
  0x58   : > { %2803 = vmatmul.mubr.msk.bf16.gmra.mxu0 %vm4511_vm2, %v4508_v33  ;;  %v1017_v21 = vsel %vm5052_vm0, %v1006_v10, %v1007_v54  ;;  %vm5053_vm14 = vmmov %vm5052_vm0  ;;  %vm5056_vm15 = vcmp.lt.s32.totalorder %v3842_v12, 7 }
  0x59   : > { %1485 = vmatprep.mubr.bf16.mxu0 %v4517_v38  ;;  %v1018_v46 = vsel %vm5053_vm14, %v1005_v39, %v1006_v10  ;;  %v3667_v39 = vld [vmem:[%s4971_s3 + $0x228] sm:$0xff]   ;;  %vm4549_vm5 = vmpackc.low %vm5041_vm6, %vm3224_vm4  ;;  %v848_v10 = vand.u32 15, %v600_v53  ;;  %v4563_v62 = vsel %vm5056_vm15, %v1091_v30, %v1092_v51  ;;  %v4571_v11 = vsel %vm5052_vm0, %v1010_v60, %v1011_v40 }
  0x5a   : > { %2876 = vmatmul.mubr.msk.bf16.vlgmr.msra.gmra.mxu1 %vm2874_vm1, %v2875_v18  ;;  %v4540_v49 = vpack.c.bf16 %v1017_v21, %v1018_v46  ;;  %vm5057_vm1 = vmmov %vm5056_vm15  ;;  %v5061_v21 = vrot.slane %v3957_v63, 1 }
  0x5b   : > { %1783 = vmatprep.mubr.bf16.mxu1 %v3982_v9  ;;  %3539 = vmatpush3.bf16.msra.mxu1 %v4426_v43  ;;  %v5054_v9 = vmov 0  ;;  %v4555_v43 = vpack.c.bf16 %v4415_v47, %v4334_v52  ;;  %v4567_v18 = vsel %vm5057_vm1, %v1092_v51, %v1073_v56  ;;  %v743_v52 = vand.u32 15, %v585_v27  ;;  %vm5058_vm14 = vmmov %vm5052_vm0  ;;  %v3682_v51 = vld [vmem:[%s4971_s3 + $0x200] sm:$0xff]  }
  0x5c   : > { %3540 = vmatprep.subr.bf16.mxu1 %v3664_v50  ;;  %v5055_v9 = vsel %vm4549_vm5, 4294967295, %v5054_v9  ;;  %v3076_v16 = vpack.c.bf16 %v4567_v18, %v4563_v62  ;;  %v4577_v47 = vsel %vm5058_vm14, %v1009_v59, %v1010_v60  ;;  %vm5059_vm4 = vmmov %vm5052_vm0  ;;  %vm3225_vm1 = vcmp.ne.s32.totalorder %v848_v10, 0  ;;  %v3663_v60 = vld [vmem:[%s4971_s3 + $0x1b0] sm:$0xff]   ;;  %v3671_v10 = vld [vmem:[%s4971_s3 + $0x1d8] sm:$0xff]  }
  0x5d   : > { %v3044_v30 = vpack.c.bf16 %v4571_v11, %v4577_v47  ;;  %v1015_v40 = vsel %vm5059_vm4, %v1008_v19, %v1009_v59  ;;  %vm5060_vm15 = vmmov %vm5052_vm0  ;;  %vm5062_vm0 = vcmp.lt.s32.totalorder %v3842_v12, 7  ;;  %v3668_v59 = vld [vmem:[%s4971_s3 + $0x1e0] sm:$0xff]  }
  0x5e   : > { %v1111_v46 = vsel %vm5062_vm0, %v1074_v4, %v5061_v21  ;;  %vm5063_vm14 = vmmov %vm5062_vm0  ;;  %v3678_v21 = vld [vmem:[%s4971_s3 + $0x188] sm:$0xff]   ;;  %vm5070_vm0 = vnez %v5055_v9 }
  0x5f   : > { %3541 = vmatpush3.bf16.msra.mxu1 %v3664_v50  ;;  %v1016_v50 = vsel %vm5060_vm15, %v1007_v54, %v1008_v19  ;;  %v1112_v53 = vsel %vm5063_vm14, %v1073_v56, %v1074_v4  ;;  %v3676_v54 = vld [vmem:[%s4971_s3 + $0x210] sm:$0xff]   ;;  %v3679_v56 = vld [vmem:[%s4971_s3 + $0x208] sm:$0xff]   ;;  %v3661_v19 = vld [vmem:[%s4971_s3 + $0x1b8] sm:$0xff]   ;;  %vm5068_vm15 = vnez %v5045_v45 }
  0x60   : > { %2807 = vmatmul.mubr.msk.bf16.gmra.mxu0 %vm4549_vm5, %v4540_v49  ;;  %3542 = vmatprep.subr.bf16.mxu1 %v3667_v39  ;;  %vm3208_vm5 = vcmp.ne.s32.totalorder %v743_v52, 15  ;;  %v4602_v27 = vpack.c.bf16 %v1015_v40, %v1016_v50  ;;  %v3669_v4 = vld [vmem:[%s4971_s3 + $0x1a0] sm:$0xff]   ;;  %v3672_v52 = vld [vmem:[%s4971_s3 + $0x198] sm:$0xff]   ;;  %v3675_v40 = vld [vmem:[%s4971_s3 + $0x190] sm:$0xff]  }
  0x61   : > { %1493 = vmatprep.mubr.bf16.mxu0 %v4555_v43  ;;  %vm2906_vm4 = vmpackc.low %vm3208_vm5, %vm5041_vm6  ;;  %vm5067_vm5 = vnez %v5029_v48  ;;  %v3677_v50 = vld [vmem:[%s4971_s3 + $0x1c8] sm:$0xff]  }
  0x62   : > { %2880 = vmatmul.mubr.msk.bf16.gmra.mxu1 %vm4011_vm8, %v4052_v34  ;;  %vm4608_vm8 = vmpackc.low %vm5041_vm6, %vm3225_vm1  ;;  %v2907_v34 = vpack.c.bf16 %v1111_v46, %v1112_v53  ;;  %v3680_v46 = vld [vmem:[%s4971_s3 + $0x1c0] sm:$0xff]   ;;  %vm5069_vm1 = vnez %v5033_v17 }
  0x63   : > { %1791 = vmatprep.mubr.bf16.mxu1 %v4018_v22  ;;  %3543 = vmatpush3.bf16.msra.mxu1 %v3667_v39  ;;  %v3662_v39 = vld [vmem:[%s4971_s3 + $0x1f0] sm:$0xff]   ;;  %v3681_v53 = vld [vmem:[%s4971_s3 + $0x180] sm:$0xff]  }
  0x64   : > { %3544 = vmatprep.subr.bf16.mxu1 %v3670_v29 }
  0x67   : > { %3545 = vmatpush3.bf16.msra.mxu1 %v3670_v29  ;;  %v3674_v29 = vld [vmem:[%s4971_s3 + $0x1d0] sm:$0xff]  }
  0x68   : > { %2811 = vmatmul.mubr.msk.bf16.gmra.mxu0 %vm4608_vm8, %v4602_v27  ;;  %3546 = vmatprep.subr.bf16.mxu1 %v3673_v20 }
  0x69   : > { %3522 = vmatprep.mubr.msk.bf16.mxu0 %vm2906_vm4, %v2907_v34 }
  0x6a   : > { %2884 = vmatmul.mubr.msk.bf16.gmra.mxu1 %vm4126_vm12, %v4113_v2 }
  0x6b   : > { %1799 = vmatprep.mubr.bf16.mxu1 %v4123_v13  ;;  %3547 = vmatpush3.bf16.msra.mxu1 %v3673_v20 }
  0x6c   : > { %3548 = vmatprep.subr.bf16.mxu1 %v3676_v54 }
  0x6f   : > { %3549 = vmatpush3.bf16.msra.mxu1 %v3676_v54 }
  0x70   : > { %3523 = vmatmul.mubr.msk.bf16.vlgmr.msra.gmra.mxu0 %vm3992_vm7, %v4030_v28  ;;  %3550 = vmatprep.subr.bf16.mxu1 %v3679_v56  ;;  %v3666_v28 = vld [vmem:[%s4971_s3 + $0x1a8] sm:$0xff]   ;;  %vm5066_vm7 = vnez %v5021_v7 }
  0x71   : > { %3395 = vmatpush3.bf16.msra.mxu0 %v3661_v19  ;;  %3526 = vmatprep.mubr.msk.bf16.mxu0 %vm4041_vm9, %v4062_v41 }
  0x72   : > { %2888 = vmatmul.mubr.msk.bf16.gmra.mxu1 %vm4243_vm10, %v4227_v8  ;;  %3396 = vmatprep.subr.bf16.mxu0 %v3662_v39 }
  0x73   : > { %1807 = vmatprep.mubr.bf16.mxu1 %v4253_v31  ;;  %3551 = vmatpush3.bf16.msra.mxu1 %v3679_v56 }
  0x74   : > { %3552 = vmatprep.subr.bf16.mxu1 %v3682_v51 }
  0x75   : > { %3397 = vmatpush3.bf16.msra.mxu0 %v3663_v60 }
  0x76   : > { %3398 = vmatprep.subr.bf16.mxu0 %v3665_v15 }
  0x77   : > { %3553 = vmatpush3.bf16.msra.mxu1 %v3682_v51 }
  0x78   : > { %3527 = vmatmul.mubr.msk.bf16.gmra.mxu0 %vm4140_vm13, %v4157_v37 }
  0x79   : > { %3399 = vmatpush3.bf16.msra.mxu0 %v3666_v28  ;;  %3530 = vmatprep.mubr.msk.bf16.mxu0 %vm4203_vm3, %v4220_v6 }
  0x7a   : > { %2892 = vmatmul.mubr.msk.bf16.gmra.mxu1 %vm4341_vm11, %v4353_v0  ;;  %3400 = vmatprep.subr.bf16.mxu0 %v3668_v59 }
  0x7b   : > { %1815 = vmatprep.mubr.bf16.mxu1 %v4405_v36 }
  0x7d   : > { %3401 = vmatpush3.bf16.msra.mxu0 %v3669_v4 }
  0x7e   : > { %3402 = vmatprep.subr.bf16.mxu0 %v3671_v10 }
  0x80   : > { %3531 = vmatmul.mubr.msk.bf16.gmra.mxu0 %vm5066_vm7, %v4273_v55 }
  0x81   : > { %3403 = vmatpush3.bf16.msra.mxu0 %v3672_v52  ;;  %3534 = vmatprep.mubr.msk.bf16.mxu0 %vm5067_vm5, %v4358_v3 }
  0x82   : > { %2896 = vmatmul.mubr.msk.bf16.gmra.mxu1 %vm5068_vm15, %v4460_v23  ;;  %3404 = vmatprep.subr.bf16.mxu0 %v3674_v29 }
  0x83   : > { %1823 = vmatprep.mubr.bf16.mxu1 %v4476_v57 }
  0x85   : > { %3405 = vmatpush3.bf16.msra.mxu0 %v3675_v40 }
  0x86   : > { %3406 = vmatprep.subr.bf16.mxu0 %v3677_v50 }
  0x88   : > { %3535 = vmatmul.mubr.msk.bf16.gmra.mxu0 %vm5069_vm1, %v4391_v61 }
  0x89   : > { %3407 = vmatpush3.bf16.msra.mxu0 %v3678_v21  ;;  %2162 = vmatprep.mubr.bf16.mxu0 %v4018_v22  ;;  %v603_v22 = vadd.s32 152, %v3842_v12 }
  0x8a   : > { %2900 = vmatmul.mubr.msk.bf16.gmra.mxu1 %vm4511_vm2, %v4508_v33  ;;  %3408 = vmatprep.subr.bf16.mxu0 %v3680_v46 }
  0x8b   : > { %1831 = vmatprep.mubr.bf16.mxu1 %v4517_v38  ;;  %v869_v32 = vand.u32 15, %v603_v22 }
  0x8d   : > { %3409 = vmatpush3.bf16.msra.mxu0 %v3681_v53 }
  0x90   : > { %3012 = vmatmul.mubr.msk.bf16.vlgmr.msra.gmra.mxu0 %vm4126_vm12, %v4113_v2  ;;  %vm3210_vm12 = vcmp.ne.s32.totalorder %v869_v32, 15 }
  0x91   : > { %2170 = vmatprep.mubr.bf16.mxu0 %v4123_v13 }
  0x92   : > { %2904 = vmatmul.mubr.msk.bf16.gmra.mxu1 %vm5070_vm0, %v4540_v49 }
  0x93   : > { %3554 = vmatprep.mubr.msk.bf16.mxu1 %vm4041_vm9, %v4062_v41  ;;  %vm5071_vm9 = vnez %v5043_v42  ;;  %v602_v41 = vadd.s32 144, %v3842_v12 }
  0x95   : > { %v862_v2 = vand.u32 15, %v602_v41 }
  0x98   : > { %3016 = vmatmul.mubr.msk.bf16.gmra.mxu0 %vm4243_vm10, %v4227_v8 }
  0x99   : > { %2178 = vmatprep.mubr.bf16.mxu0 %v4253_v31 }
  0x9a   : > { %3555 = vmatmul.mubr.msk.bf16.vlgmr.msra.gmra.mxu1 %vm4140_vm13, %v4157_v37  ;;  %vm3075_vm13 = vmpackc.low %vm3210_vm12, %vm5041_vm6 }
  0x9b   : > { %3558 = vmatprep.mubr.msk.bf16.mxu1 %vm4203_vm3, %v4220_v6  ;;  %vm5072_vm3 = vnez %v5035_v58 }
  0x9c   : > { %vm3037_vm10 = vmneg %vm5072_vm3 }
  0xa0   : > { %3020 = vmatmul.mubr.msk.bf16.gmra.mxu0 %vm4341_vm11, %v4353_v0  ;;  %vm3039_vm11 = vmpackc.low %vm3037_vm10, %vm3037_vm10 }
  0xa1   : > { %2186 = vmatprep.mubr.bf16.mxu0 %v4405_v36 }
  0xa2   : > { %3559 = vmatmul.mubr.msk.bf16.gmra.mxu1 %vm5066_vm7, %v4273_v55 }
  0xa3   : > { %3562 = vmatprep.mubr.msk.bf16.mxu1 %vm5067_vm5, %v4358_v3 }
  0xa8   : > { %3024 = vmatmul.mubr.msk.bf16.gmra.mxu0 %vm5068_vm15, %v4460_v23 }
  0xa9   : > { %2194 = vmatprep.mubr.bf16.mxu0 %v4476_v57 }
  0xaa   : > { %3563 = vmatmul.mubr.msk.bf16.gmra.mxu1 %vm5069_vm1, %v4391_v61 }
  0xab   : > { %3566 = vmatprep.mubr.msk.bf16.mxu1 %vm5071_vm9, %v4478_v35 }
  0xb0   : > { %3028 = vmatmul.mubr.msk.bf16.gmra.mxu0 %vm4511_vm2, %v4508_v33  ;;  %vm3209_vm2 = vcmp.ne.s32.totalorder %v862_v2, 0 }
  0xb1   : > { %2202 = vmatprep.mubr.bf16.mxu0 %v4517_v38  ;;  %vm3043_vm14 = vmpackc.low %vm5041_vm6, %vm3209_vm2 }
  0xb2   : > { %3567 = vmatmul.mubr.msk.bf16.gmra.mxu1 %vm3075_vm13, %v3076_v16 }
  0xb8   : > { %3032 = vmatmul.mubr.msk.bf16.gmra.mxu0 %vm5070_vm0, %v4540_v49 }
  0xb9   : > { %2210 = vmatprep.mubr.bf16.mxu0 %v4555_v43 }
  0xc0   : > { %3036 = vmatmul.mubr.msk.bf16.gmra.mxu0 %vm4608_vm8, %v4602_v27 }
  0xc1   : > { %3041 = vmatprep.mubr.msk.bf16.mxu0 %vm3039_vm11, %v4522_v5 }
  0xc8   : > { %3045 = vmatmul.mubr.msk.bf16.gmra.mxu0 %vm3043_vm14, %v3044_v30 }
  0xf0   : > { %v3250_v13 = vpop.f32.mrf.mxu0  ;;  %v3492_v12 = vpop.f32.mrf.mxu1 }
  0xf2   : > { %v3251_v14 = vpop.f32.mrf.mxu0  ;;  %v1536_v37 = vpop.f32.mrf.mxu1 }
  0xf3   : > { %v3252_v26 = vadd.f32 %v3251_v14, %v3250_v13 }
  0xf4   : > { %v3253_v1 = vpop.f32.mrf.mxu0  ;;  %v3493_v7 = vpop.f32.mrf.mxu1 }
  0xf5   : > { %v1537_v6 = vadd.f32 %v3252_v26, %v1536_v37 }
  0xf6   : > { %v3254_v8 = vpop.f32.mrf.mxu0  ;;  %v1539_v31 = vpop.f32.mrf.mxu1 }
  0xf7   : > { %v3255_v25 = vadd.f32 %v3254_v8, %v3253_v1 }
  0xf8   : > { %v3256_v55 = vpop.f32.mrf.mxu0 }
  0xf9   : > { %v4776_v48 = vadd.f32 %v3255_v25, %v1539_v31 }
  0xfa   : > { %v3257_v44 = vpop.f32.mrf.mxu0 }
  0xfb   : > { %v3258_v0 = vadd.f32 %v3257_v44, %v3256_v55  ;;  %v3496_v58 = vpop.f32.mrf.mxu1 }
  0xfc   : > { %v3259_v3 = vpop.f32.mrf.mxu0 }
  0xfd   : > { %v4778_v17 = vadd.f32 %v3492_v12, %v3258_v0  ;;  %v1552_v42 = vpop.f32.mrf.mxu1 }
  0xfe   : > { %v3260_v61 = vpop.f32.mrf.mxu0 }
  0xff   : > { %v3261_v36 = vadd.f32 %v3260_v61, %v3259_v3  ;;  %v3497_v57 = vpop.f32.mrf.mxu1 }
 0x100   : > { %v3262_v23 = vpop.f32.mrf.mxu0 }
 0x101   : > { %v4780_v45 = vadd.f32 %v3493_v7, %v3261_v36  ;;  %v1555_v38 = vpop.f32.mrf.mxu1 }
 0x102   : > { %v3263_v35 = vpop.f32.mrf.mxu0 }
 0x103   : > { %v3264_v33 = vadd.f32 %v3263_v35, %v3262_v23 }
 0x104   : > { %v3265_v24 = vpop.f32.mrf.mxu0 }
 0x105   : > { %v4782_v5 = vadd.f32 %v3264_v33, %v1552_v42 }
 0x106   : > { %v3266_v49 = vpop.f32.mrf.mxu0 }
 0x107   : > { %v3267_v9 = vadd.f32 %v3266_v49, %v3265_v24  ;;  %v3500_v62 = vpop.f32.mrf.mxu1 }
 0x108   : > { %v3268_v43 = vpop.f32.mrf.mxu0 }
 0x109   : > { %v4784_v18 = vadd.f32 %v3267_v9, %v1555_v38  ;;  %v1568_v16 = vpop.f32.mrf.mxu1 }
 0x10a   : > { %v3269_v11 = vpop.f32.mrf.mxu0 }
 0x10b   : > { %v3270_v47 = vadd.f32 %v3269_v11, %v3268_v43  ;;  %v3501_v27 = vpop.f32.mrf.mxu1 }
 0x10c   : > { %v3271_v30 = vpop.f32.mrf.mxu0 }
 0x10d   : > { %v4786_v20 = vadd.f32 %v3496_v58, %v3270_v47  ;;  %v1571_v54 = vpop.f32.mrf.mxu1 }
 0x10e   : > { %v3272_v63 = vpop.f32.mrf.mxu0 }
 0x10f   : > { %v3273_v34 = vadd.f32 %v3272_v63, %v3271_v30 }
 0x110   : > { %v3274_v19 = vpop.f32.mrf.mxu0 }
 0x111   : > { %v4788_v56 = vadd.f32 %v3497_v57, %v3273_v34 }
 0x112   : > { %v3504_v39 = vpop.f32.mrf.mxu1  ;;  %v3275_v51 = vpop.f32.mrf.mxu0 }
 0x113   : > { %v3276_v60 = vadd.f32 %v3275_v51, %v3274_v19 }
 0x114   : > { %v1584_v15 = vpop.f32.mrf.mxu1  ;;  %v3277_v28 = vpop.f32.mrf.mxu0 }
 0x115   : > { %v4790_v59 = vadd.f32 %v3276_v60, %v1568_v16 }
 0x116   : > { %v3505_v4 = vpop.f32.mrf.mxu1  ;;  %v3278_v10 = vpop.f32.mrf.mxu0 }
 0x117   : > { %v3279_v52 = vadd.f32 %v3278_v10, %v3277_v28 }
 0x118   : > { %v1587_v29 = vpop.f32.mrf.mxu1  ;;  %v3280_v40 = vpop.f32.mrf.mxu0 }
 0x119   : > { %v4792_v50 = vadd.f32 %v3279_v52, %v1571_v54 }
 0x11a   : > { %v3330_v21 = vpop.f32.mrf.mxu1  ;;  %v3281_v46 = vpop.f32.mrf.mxu0 }
 0x11b   : > { %v3282_v53 = vadd.f32 %v3281_v46, %v3280_v40 }
 0x11c   : > { %v3331_v22 = vpop.f32.mrf.mxu1  ;;  %v3283_v32 = vpop.f32.mrf.mxu0 }
 0x11d   : > { %v3332_v41 = vadd.f32 %v3331_v22, %v3330_v21  ;;  %v1577_v2 = vadd.f32 %v3500_v62, %v3282_v53 }
 0x11e   : > { %v4794_v13 = vpop.f32.mrf.mxu1  ;;  %v3284_v12 = vpop.f32.mrf.mxu0 }
 0x11f   : > { %v3285_v14 = vadd.f32 %v3284_v12, %v3283_v32  ;;  %v4796_v26 = vadd.f32 %v3332_v41, %v1537_v6 }
 0x120   : > { %v4798_v37 = vpop.f32.mrf.mxu1  ;;  %v3286_v1 = vpop.f32.mrf.mxu0 }
 0x121   : > { %v4800_v7 = vadd.f32 %v3501_v27, %v3285_v14 }
 0x122   : > { %v4802_v8 = vpop.f32.mrf.mxu1  ;;  %v3287_v25 = vpop.f32.mrf.mxu0 }
 0x123   : > { %5073 = vst [vmem:[#allocation2_spill] sm:$0xff] %v4800_v7  ;;  %v3288_v31 = vadd.f32 %v3287_v25, %v3286_v1 }
 0x124   : > { %v4804_v55 = vpop.f32.mrf.mxu1  ;;  %v3289_v44 = vpop.f32.mrf.mxu0 }
 0x125   : > { %v4806_v0 = vadd.f32 %v3288_v31, %v1584_v15 }
 0x126   : > { %v4808_v3 = vpop.f32.mrf.mxu1  ;;  %v3290_v58 = vpop.f32.mrf.mxu0 }
 0x127   : > { %5074 = vst [vmem:[#allocation3_spill] sm:$0xff] %v4806_v0  ;;  %v3291_v61 = vadd.f32 %v3290_v58, %v3289_v44 }
 0x128   : > { %v4810_v6 = vpop.f32.mrf.mxu1  ;;  %v3292_v36 = vpop.f32.mrf.mxu0 }
 0x129   : > { %v4812_v42 = vadd.f32 %v3291_v61, %v1587_v29 }
 0x12a   : > { %v4814_v23 = vpop.f32.mrf.mxu1  ;;  %v3293_v57 = vpop.f32.mrf.mxu0 }
 0x12b   : > { %5075 = vst [vmem:[#allocation4_spill] sm:$0xff] %v4812_v42  ;;  %v3294_v35 = vadd.f32 %v3293_v57, %v3292_v36  ;;  %v3338_v42 = vadd.f32 %v4804_v55, %v4802_v8 }
 0x12c   : > { %v4816_v33 = vpop.f32.mrf.mxu1  ;;  %v3295_v24 = vpop.f32.mrf.mxu0 }
 0x12d   : > { %v1593_v38 = vadd.f32 %v3504_v39, %v3294_v35 }
 0x12e   : > { %v4818_v49 = vpop.f32.mrf.mxu1  ;;  %v3296_v9 = vpop.f32.mrf.mxu0 }
 0x12f   : > { %v3297_v43 = vadd.f32 %v3296_v9, %v3295_v24 }
 0x130   : > { %v4820_v62 = vpop.f32.mrf.mxu1  ;;  %v4822_v11 = vpop.f32.mrf.mxu0 }
 0x131   : > { %v1596_v16 = vadd.f32 %v3505_v4, %v3297_v43 }
 0x132   : > { %v4824_v47 = vpop.f32.mrf.mxu1  ;;  %v1874_v30 = vpop.f32.mrf.mxu0 }
 0x134   : > { %v4826_v27 = vpop.f32.mrf.mxu1  ;;  %v4828_v63 = vpop.f32.mrf.mxu0 }
 0x136   : > { %v4830_v34 = vpop.f32.mrf.mxu1  ;;  %v4832_v54 = vpop.f32.mrf.mxu0 }
 0x138   : > { %v4834_v19 = vpop.f32.mrf.mxu1  ;;  %v4836_v39 = vpop.f32.mrf.mxu0 }
 0x13a   : > { %v4838_v51 = vpop.f32.mrf.mxu1  ;;  %v4840_v60 = vpop.f32.mrf.mxu0 }
 0x13c   : > { %v4842_v15 = vpop.f32.mrf.mxu1  ;;  %v4844_v28 = vpop.f32.mrf.mxu0 }
 0x13e   : > { %v4846_v4 = vpop.f32.mrf.mxu1  ;;  %v4848_v10 = vpop.f32.mrf.mxu0 }
 0x140   : > { %v4850_v52 = vpop.f32.mrf.mxu1  ;;  %v3532_v29 = vpop.f32.mrf.mxu0 }
 0x142   : > { %v3360_v40 = vpop.f32.mrf.mxu1  ;;  %v4852_v21 = vpop.f32.mrf.mxu0 }
 0x144   : > { %v3361_v46 = vpop.f32.mrf.mxu1  ;;  %v4854_v53 = vpop.f32.mrf.mxu0 }
 0x145   : > { %5076 = vst [vmem:[#allocation5_spill] sm:$0xff] %v4854_v53  ;;  %v3362_v22 = vadd.f32 %v3361_v46, %v3360_v40 }
 0x146   : > { %v4856_v32 = vpop.f32.mrf.mxu1  ;;  %v4858_v41 = vpop.f32.mrf.mxu0 }
 0x147   : > { %v1818_v12 = vadd.f32 %v3362_v22, %v1577_v2 }
 0x148   : > { %v4860_v14 = vpop.f32.mrf.mxu1  ;;  %v3536_v1 = vpop.f32.mrf.mxu0 }
 0x149   : > { %v4862_v25 = vadd.f32 %v3532_v29, %v1818_v12 }
 0x14a   : > { %v4864_v31 = vpop.f32.mrf.mxu1  ;;  %v4866_v44 = vpop.f32.mrf.mxu0 }
 0x14b   : > { %5077 = vst [vmem:[#allocation6_spill] sm:$0xff] %v4862_v25  ;;  %5078 = vst [vmem:[#allocation7_spill] sm:$0xff] %v4866_v44 }
 0x14c   : > { %v4868_v58 = vpop.f32.mrf.mxu1  ;;  %v3537_v61 = vpop.f32.mrf.mxu0 }
 0x14d   : > { %5079 = vst [vmem:[#allocation8_spill] sm:$0xff] %v4868_v58 }
 0x14e   : > { %v4870_v36 = vpop.f32.mrf.mxu1  ;;  %v4872_v57 = vpop.f32.mrf.mxu0 }
 0x14f   : > { %5080 = vst [vmem:[#allocation9_spill] sm:$0xff] %v4870_v36  ;;  %5081 = vst [vmem:[#allocation10_spill] sm:$0xff] %v4872_v57 }
 0x150   : > { %v4874_v35 = vpop.f32.mrf.mxu1  ;;  %v3410_v24 = vpop.f32.mrf.mxu0 }
 0x151   : > { %5082 = vst [vmem:[#allocation11_spill] sm:$0xff] %v4874_v35  ;;  %v3341_v35 = vadd.f32 %v4810_v6, %v4808_v3 }
 0x152   : > { %v3372_v2 = vpop.f32.mrf.mxu1  ;;  %v3411_v9 = vpop.f32.mrf.mxu0 }
 0x153   : > { %v3412_v57 = vadd.f32 %v3411_v9, %v3410_v24  ;;  %v1875_v24 = vadd.f32 %v1874_v30, %v4796_v26  ;;  %v1789_v3 = vadd.f32 %v3341_v35, %v4780_v45 }
 0x154   : > { %v3373_v43 = vpop.f32.mrf.mxu1  ;;  %v3413_v40 = vpop.f32.mrf.mxu0 }
 0x155   : > { %v3374_v29 = vadd.f32 %v3373_v43, %v3372_v2  ;;  %v3335_v2 = vadd.f32 %v4798_v37, %v4794_v13 }
 0x156   : > { %v3375_v46 = vpop.f32.mrf.mxu1  ;;  %v3414_v22 = vpop.f32.mrf.mxu0 }
 0x157   : > { %v1834_v12 = vadd.f32 %v3374_v29, %v1593_v38  ;;  %v1786_v38 = vadd.f32 %v3338_v42, %v4778_v17  ;;  %v1781_v13 = vadd.f32 %v3335_v2, %v4776_v48  ;;  %v3344_v17 = vadd.f32 %v4816_v33, %v4814_v23 }
 0x158   : > { %v3376_v44 = vpop.f32.mrf.mxu1  ;;  %v3416_v0 = vpop.f32.mrf.mxu0 }
 0x159   : > { %v4878_v53 = vadd.f32 %v3536_v1, %v1834_v12  ;;  %v3377_v36 = vadd.f32 %v3376_v44, %v3375_v46  ;;  %v3415_v12 = vadd.f32 %v3414_v22, %v3413_v40  ;;  %v1883_v46 = vadd.f32 %v4822_v11, %v1786_v38 }
 0x15a   : > { %v3556_v25 = vpop.f32.mrf.mxu1  ;;  %v3417_v7 = vpop.f32.mrf.mxu0  ;;  %v1878_v26 = vadd.f32 %v4832_v54, %v1781_v13  ;;  %v3347_v11 = vadd.f32 %v4820_v62, %v4818_v49  ;;  %v1794_v23 = vadd.f32 %v3344_v17, %v4782_v5 }
 0x15b   : > { %v1837_v43 = vadd.f32 %v3377_v36, %v1596_v16  ;;  %v3418_v58 = vadd.f32 %v3417_v7, %v3416_v0  ;;  %v1886_v7 = vadd.f32 %v4828_v63, %v1789_v3 }
 0x15c   : > { %v2261_v29 = vpop.f32.mrf.mxu1  ;;  %v3419_v8 = vpop.f32.mrf.mxu0  ;;  %v1891_v22 = vadd.f32 %v4840_v60, %v1794_v23  ;;  %v1797_v2 = vadd.f32 %v3347_v11, %v4784_v18 }
 0x15d   : > { %v4885_v55 = vadd.f32 %v3537_v61, %v1837_v43  ;;  %v2262_v1 = vadd.f32 %v3412_v57, %v2261_v29  ;;  %v2270_v44 = vadd.f32 %v3556_v25, %v3418_v58 }
 0x15e   : > { %v3557_v6 = vpop.f32.mrf.mxu1  ;;  %v3420_v9 = vpop.f32.mrf.mxu0  ;;  %v1894_v60 = vadd.f32 %v4848_v10, %v1797_v2 }
 0x15f   : > { %v3421_v37 = vadd.f32 %v3420_v9, %v3419_v8  ;;  %v2324_v0 = vadd.f32 %v2262_v1, %v1875_v24  ;;  %v2326_v45 = vadd.f32 %v2270_v44, %v1883_v46  ;;  %v3350_v24 = vadd.f32 %v4826_v27, %v4824_v47 }
 0x160   : > { %v2264_v42 = vpop.f32.mrf.mxu1  ;;  %v3422_v16 = vpop.f32.mrf.mxu0 }
 0x161   : > { %v2265_v30 = vadd.f32 %v3415_v12, %v2264_v42  ;;  %v2273_v25 = vadd.f32 %v3557_v6, %v3421_v37  ;;  %v2362_v33 = vmul.f32 %v2324_v0, %v2324_v0  ;;  %v2364_v40 = vmul.f32 %v2326_v45, %v2326_v45 }
 0x162   : > { %v3423_v58 = vpop.f32.mrf.mxu0  ;;  %v3560_v48 = vpop.f32.mrf.mxu1  ;;  %v3353_v37 = vadd.f32 %v4834_v19, %v4830_v34  ;;  %v1802_v27 = vadd.f32 %v3350_v24, %v4786_v20 }
 0x163   : > { %v2325_v61 = vadd.f32 %v2265_v30, %v1878_v26  ;;  %v2327_v36 = vadd.f32 %v2273_v25, %v1886_v7  ;;  %v3424_v57 = vadd.f32 %v3423_v58, %v3422_v16  ;;  %v3356_v58 = vadd.f32 %v4842_v15, %v4838_v51 }
 0x164   : > { %v3425_v63 = vpop.f32.mrf.mxu0  ;;  %v2277_v54 = vpop.f32.mrf.mxu1  ;;  %v1899_v34 = vadd.f32 %v4836_v39, %v1802_v27  ;;  %v3359_v15 = vadd.f32 %v4850_v52, %v4846_v4  ;;  %v5084_v27 = vld [vmem:[#allocation2_spill] sm:$0xff] }
 0x165   : > { %v2340_v35 = vadd.f32 %v2325_v61, %v2324_v0  ;;  %v2363_v49 = vmul.f32 %v2325_v61, %v2325_v61  ;;  %v3163_v62 = vpack.c.bf16 %v2325_v61, %v2324_v0  ;;  %v3168_v5 = vpack.c.bf16 %v2327_v36, %v2326_v45 }
 0x166   : > { %v2278_v43 = vadd.f32 %v3424_v57, %v2277_v54  ;;  %v3426_v38 = vpop.f32.mrf.mxu0  ;;  %v3561_v29 = vpop.f32.mrf.mxu1  ;;  %v2365_v12 = vmul.f32 %v2327_v36, %v2327_v36  ;;  %v1805_v57 = vadd.f32 %v3353_v37, %v4788_v56 }
 0x167   : > { %v2378_v8 = vadd.f32 %v2363_v49, %v2362_v33  ;;  %3164 = vst [vmem:[%s4903_s13] sm:$0xff] %v3163_v62   ;;  %v2341_v1 = vadd.f32 %v2340_v35, %v2326_v45  ;;  %v3427_v44 = vadd.f32 %v3426_v38, %v3425_v63  ;;  %3211 = vst [vmem:[%s4903_s13 + $0x8] sm:$0xff] %v3168_v5  }
 0x168   : > { %v2328_v3 = vadd.f32 %v2278_v43, %v1891_v22  ;;  %v3428_v6 = vpop.f32.mrf.mxu0  ;;  %v2280_v9 = vpop.f32.mrf.mxu1  ;;  %v1902_v54 = vadd.f32 %v4844_v28, %v1805_v57  ;;  %v1810_v49 = vadd.f32 %v3356_v58, %v4790_v59  ;;  %v5086_v58 = vld [vmem:[#allocation5_spill] sm:$0xff]  ;;  %v5087_v57 = vld [vmem:[#allocation3_spill] sm:$0xff] }
 0x169   : > { %v2379_v46 = vadd.f32 %v2378_v8, %v2364_v40  ;;  %v2342_v18 = vadd.f32 %v2341_v1, %v2327_v36  ;;  %v2281_v13 = vadd.f32 %v3427_v44, %v2280_v9  ;;  %v1813_v1 = vadd.f32 %v3359_v15, %v4792_v50 }
 0x16a   : > { %v2366_v17 = vmul.f32 %v2328_v3, %v2328_v3  ;;  %v3429_v7 = vpop.f32.mrf.mxu0  ;;  %v3564_v0 = vpop.f32.mrf.mxu1  ;;  %v1907_v22 = vadd.f32 %v4852_v21, %v1810_v49  ;;  %v5090_v49 = vld [vmem:[#allocation7_spill] sm:$0xff] }
 0x16b   : > { %v2343_v42 = vadd.f32 %v2342_v18, %v2328_v3  ;;  %v2380_v16 = vadd.f32 %v2379_v46, %v2365_v12  ;;  %v2329_v26 = vadd.f32 %v2281_v13, %v1894_v60  ;;  %v3430_v47 = vadd.f32 %v3429_v7, %v3428_v6 }
 0x16c   : > { %v3431_v30 = vpop.f32.mrf.mxu0  ;;  %v2293_v36 = vpop.f32.mrf.mxu1  ;;  %v1910_v4 = vadd.f32 %v4858_v41, %v1813_v1  ;;  %v3365_v60 = vadd.f32 %v4860_v14, %v4856_v32 }
 0x16d   : > { %v2381_v45 = vadd.f32 %v2380_v16, %v2366_v17  ;;  %v2344_v25 = vadd.f32 %v2343_v42, %v2329_v26  ;;  %v2367_v10 = vmul.f32 %v2329_v26, %v2329_v26  ;;  %v3173_v11 = vpack.c.bf16 %v2329_v26, %v2328_v3  ;;  %v5083_v26 = vld [vmem:[#allocation8_spill] sm:$0xff] }
 0x16e   : > { %v2286_v19 = vadd.f32 %v3560_v48, %v3430_v47  ;;  %v3432_v61 = vpop.f32.mrf.mxu0  ;;  %v3565_v39 = vpop.f32.mrf.mxu1  ;;  %v3368_v41 = vadd.f32 %v5083_v26, %v4864_v31  ;;  %v5088_v31 = vld [vmem:[#allocation9_spill] sm:$0xff] }
 0x16f   : > { %v2382_v23 = vadd.f32 %v2381_v45, %v2367_v10  ;;  %3212 = vst [vmem:[%s4903_s13 + $0x10] sm:$0xff] %v3173_v11   ;;  %v3433_v33 = vadd.f32 %v3432_v61, %v3431_v30  ;;  %v1821_v30 = vadd.f32 %v3365_v60, %v5084_v27 }
 0x170   : > { %v2330_v63 = vadd.f32 %v2286_v19, %v1899_v34  ;;  %v3434_v20 = vpop.f32.mrf.mxu0  ;;  %v2296_v59 = vpop.f32.mrf.mxu1 }
 0x171   : > { %v2289_v35 = vadd.f32 %v3561_v29, %v3433_v33  ;;  %v1918_v34 = vadd.f32 %v5086_v58, %v1821_v30  ;;  %v5089_v33 = vld [vmem:[#allocation11_spill] sm:$0xff] }
 0x172   : > { %v2345_v62 = vadd.f32 %v2344_v25, %v2330_v63  ;;  %v2368_v40 = vmul.f32 %v2330_v63, %v2330_v63  ;;  %v3435_v51 = vpop.f32.mrf.mxu0  ;;  %v3568_v50 = vpop.f32.mrf.mxu1  ;;  %v5085_v25 = vld [vmem:[#allocation6_spill] sm:$0xff] }
 0x173   : > { %v2331_v48 = vadd.f32 %v2289_v35, %v1902_v54  ;;  %v3436_v56 = vadd.f32 %v3435_v51, %v3434_v20 }
 0x174   : > { %v2383_v2 = vadd.f32 %v2382_v23, %v2368_v40  ;;  %v3437_v5 = vpop.f32.mrf.mxu0  ;;  %v2309_v11 = vpop.f32.mrf.mxu1 }
 0x175   : > { %v2369_v43 = vmul.f32 %v2331_v48, %v2331_v48  ;;  %v3178_v38 = vpack.c.bf16 %v2331_v48, %v2330_v63  ;;  %v2294_v28 = vadd.f32 %v3436_v56, %v2293_v36  ;;  %v2346_v29 = vadd.f32 %v2345_v62, %v2331_v48 }
 0x176   : > { %v3438_v8 = vpop.f32.mrf.mxu0  ;;  %v3371_v63 = vadd.f32 %v5089_v33, %v5088_v31  ;;  %v3569_v51 = vpop.f32.mrf.mxu1 }
 0x177   : > { %3213 = vst [vmem:[%s4903_s13 + $0x18] sm:$0xff] %v3178_v38   ;;  %v2332_v12 = vadd.f32 %v2294_v28, %v1907_v22  ;;  %v2384_v44 = vadd.f32 %v2383_v2, %v2369_v43  ;;  %v3439_v24 = vadd.f32 %v3438_v8, %v3437_v5 }
 0x178   : > { %v3440_v3 = vpop.f32.mrf.mxu0 }
 0x179   : > { %v2347_v52 = vadd.f32 %v2346_v29, %v2332_v12  ;;  %v2370_v6 = vmul.f32 %v2332_v12, %v2332_v12  ;;  %v2297_v21 = vadd.f32 %v3439_v24, %v2296_v59  ;;  %v2312_v29 = vpop.f32.mrf.mxu1  ;;  %v5092_v59 = vld [vmem:[#allocation10_spill] sm:$0xff] }
 0x17a   : > { %v3441_v9 = vpop.f32.mrf.mxu0 }
 0x17b   : > { %v2385_v46 = vadd.f32 %v2384_v44, %v2370_v6  ;;  %v2333_v18 = vadd.f32 %v2297_v21, %v1910_v4  ;;  %v3442_v13 = vadd.f32 %v3441_v9, %v3440_v3 }
 0x17c   : > { %v3443_v37 = vpop.f32.mrf.mxu0 }
 0x17d   : > { %v2348_v17 = vadd.f32 %v2347_v52, %v2333_v18  ;;  %v2371_v7 = vmul.f32 %v2333_v18, %v2333_v18  ;;  %v3183_v42 = vpack.c.bf16 %v2333_v18, %v2332_v12  ;;  %v2302_v16 = vadd.f32 %v3564_v0, %v3442_v13 }
 0x17e   : > { %v3444_v47 = vpop.f32.mrf.mxu0  ;;  %v1826_v0 = vadd.f32 %v3368_v41, %v5087_v57 }
 0x17f   : > { %v2386_v45 = vadd.f32 %v2385_v46, %v2371_v7  ;;  %3214 = vst [vmem:[%s4903_s13 + $0x20] sm:$0xff] %v3183_v42   ;;  %v2334_v10 = vadd.f32 %v2302_v16, %v5085_v25  ;;  %v3445_v32 = vadd.f32 %v3444_v47, %v3443_v37 }
 0x180   : > { %v3446_v14 = vpop.f32.mrf.mxu0  ;;  %v1923_v62 = vadd.f32 %v5090_v49, %v1826_v0 }
 0x181   : > { %v2349_v19 = vadd.f32 %v2348_v17, %v2334_v10  ;;  %v2372_v61 = vmul.f32 %v2334_v10, %v2334_v10  ;;  %v2305_v36 = vadd.f32 %v3565_v39, %v3445_v32  ;;  %v5091_v39 = vld [vmem:[#allocation4_spill] sm:$0xff] }
 0x182   : > { %v3447_v23 = vpop.f32.mrf.mxu0  ;;  %v1829_v5 = vadd.f32 %v3371_v63, %v5091_v39 }
 0x183   : > { %v2387_v20 = vadd.f32 %v2386_v45, %v2372_v61  ;;  %v2335_v54 = vadd.f32 %v2305_v36, %v1918_v34  ;;  %v3448_v35 = vadd.f32 %v3447_v23, %v3446_v14 }
 0x184   : > { %v3449_v40 = vpop.f32.mrf.mxu0  ;;  %v1926_v1 = vadd.f32 %v5092_v59, %v1829_v5 }
 0x185   : > { %v2373_v15 = vmul.f32 %v2335_v54, %v2335_v54  ;;  %v3188_v48 = vpack.c.bf16 %v2335_v54, %v2334_v10  ;;  %v2310_v56 = vadd.f32 %v3448_v35, %v2309_v11  ;;  %v2350_v22 = vadd.f32 %v2349_v19, %v2335_v54 }
 0x186   : > { %v3450_v2 = vpop.f32.mrf.mxu0 }
 0x187   : > { %3215 = vst [vmem:[%s4903_s13 + $0x28] sm:$0xff] %v3188_v48   ;;  %v2336_v43 = vadd.f32 %v2310_v56, %v1923_v62  ;;  %v2388_v38 = vadd.f32 %v2387_v20, %v2373_v15  ;;  %v3451_v28 = vadd.f32 %v3450_v2, %v3449_v40 }
 0x188   : > { %v3452_v8 = vpop.f32.mrf.mxu0 }
 0x189   : > { %v2351_v12 = vadd.f32 %v2350_v22, %v2336_v43  ;;  %v2374_v44 = vmul.f32 %v2336_v43, %v2336_v43  ;;  %v2313_v24 = vadd.f32 %v3451_v28, %v2312_v29 }
 0x18a   : > { %v3453_v3 = vpop.f32.mrf.mxu0 }
 0x18b   : > { %v2389_v4 = vadd.f32 %v2388_v38, %v2374_v44  ;;  %v2337_v52 = vadd.f32 %v2313_v24, %v1926_v1  ;;  %v3454_v6 = vadd.f32 %v3453_v3, %v3452_v8 }
 0x18c   : > { %v3455_v21 = vpop.f32.mrf.mxu0 }
 0x18d   : > { %v2352_v9 = vadd.f32 %v2351_v12, %v2337_v52  ;;  %v2375_v60 = vmul.f32 %v2337_v52, %v2337_v52  ;;  %v3193_v46 = vpack.c.bf16 %v2337_v52, %v2336_v43  ;;  %v2318_v18 = vadd.f32 %v3568_v50, %v3454_v6 }
 0x18e   : > { %v3456_v13 = vpop.f32.mrf.mxu0 }
 0x18f   : > { %v2390_v37 = vadd.f32 %v2389_v4, %v2375_v60  ;;  %3216 = vst [vmem:[%s4903_s13 + $0x30] sm:$0xff] %v3193_v46   ;;  %v2338_v17 = vadd.f32 %v2318_v18, %v4878_v53  ;;  %v3457_v7 = vadd.f32 %v3456_v13, %v3455_v21 }
 0x191   : > { %v2353_v42 = vadd.f32 %v2352_v9, %v2338_v17  ;;  %v2376_v16 = vmul.f32 %v2338_v17, %v2338_v17  ;;  %v2321_v26 = vadd.f32 %v3569_v51, %v3457_v7 }
 0x193   : > { %v2391_v41 = vadd.f32 %v2390_v37, %v2376_v16  ;;  %v2339_v47 = vadd.f32 %v2321_v26, %v4885_v55 }
 0x195   : > { %v2354_v27 = vadd.f32 %v2353_v42, %v2339_v47  ;;  %v2377_v30 = vmul.f32 %v2339_v47, %v2339_v47  ;;  %v3198_v45 = vpack.c.bf16 %v2339_v47, %v2338_v17 }
 0x197   : > { %v2355_v50 = vrot.slane %v2354_v27, 4  ;;  %v2392_v25 = vadd.f32 %v2391_v41, %v2377_v30  ;;  %3217 = vst [vmem:[%s4903_s13 + $0x38] sm:$0xff] %v3198_v45  }
 0x199   : > { %v2356_v10 = vadd.f32 %v2355_v50, %v2354_v27  ;;  %v2393_v32 = vrot.slane %v2392_v25, 4 }
 0x19b   : > { %v2357_v53 = vrot.slane %v2356_v10, 2  ;;  %v2394_v14 = vadd.f32 %v2393_v32, %v2392_v25 }
 0x19d   : > { %v2358_v11 = vadd.f32 %v2357_v53, %v2356_v10  ;;  %v2395_v58 = vrot.slane %v2394_v14, 2 }
 0x19f   : > { %v2359_v34 = vrot.slane %v2358_v11, 1  ;;  %v2396_v19 = vadd.f32 %v2395_v58, %v2394_v14 }
 0x1a1   : > { %v2360_v55 = vadd.f32 %v2359_v34, %v2358_v11  ;;  %v2397_v61 = vrot.slane %v2396_v19, 1 }
 0x1a3   : > { %2361 = vst [vmem:[%s467_s17] sm:$0x1] %v2360_v55  ;;  %v2398_v36 = vadd.f32 %v2397_v61, %v2396_v19 }
 0x1a5   : > { %2399 = vst [vmem:[%s467_s17 + $0x1] sm:$0x1] %v2398_v36 }
 0x1a6 PF: > { %s18_s28 = sadd.s32 1, %s3721_s28   ;;  %s5093_s24 = smov %s3713_s26 }
 0x1a7   : > { %p15_p13 = scmp.ge.s32.totalorder %s18_s28, 6   ;;  %s5094_s25 = smov %s3717_s27 }
 0x1a8   : > { %s5095_s26 = smov %s5098_s29  ;;  %s5096_s27 = smov %s5102_s30 }
 0x1a9   :  { %17 = sbr.rel (!%p15_p13) target bundleno = 3 (0x3), region = 94 }

</bundles_post_ra>
